<compile_context>
chip_gen: v7x
topology: tpu7x:2x2x1
jax: 0.10.0
libtpu: 0.0.40
codegen_flags: <defaults>
</compile_context>

<pallas_src>
import functools

import jax
import jax.numpy as jnp
from jax.experimental import pallas as pl
from jax.experimental.pallas import tpu as pltpu


# ----------------------------------------------------------------------------
# Fused kernel: num_layers x LSTM + FC, everything resident in VMEM.
# ----------------------------------------------------------------------------
def _fused_lstm_fc_kernel(*refs, num_layers, hidden_size, seq_len, batch):
    H, T, B = hidden_size, seq_len, batch

    x_ref = refs[0]                                  # (T*B, input_size)
    layer_refs = refs[1:1 + 3 * num_layers]          # per layer: wih, whh, bias
    wfc_ref = refs[1 + 3 * num_layers]               # (H, O_pad)
    bfc_ref = refs[2 + 3 * num_layers]               # (1, O_pad)
    out_ref = refs[3 + 3 * num_layers]               # (B, O_pad)
    gx_sc = refs[4 + 3 * num_layers]                 # (T*B, 4H) f32 scratch
    seq_sc = refs[5 + 3 * num_layers]                # (T*B, H)  f32 scratch

    h = None
    for layer in range(num_layers):
        wih = layer_refs[3 * layer][...]             # (in_dim_l, 4H)
        whh = layer_refs[3 * layer + 1][...]         # (H, 4H)
        bias = layer_refs[3 * layer + 2][...]        # (1, 4H) = b_ih + b_hh

        # Input projection + bias for every timestep in ONE matmul, off the
        # serial recurrent path.  Layer 0 reads the input; deeper layers read
        # the previous layer's hidden sequence from VMEM scratch.
        src = x_ref[...] if layer == 0 else seq_sc[...]
        gx_sc[...] = (jnp.dot(src, wih, preferred_element_type=jnp.float32)
                      + bias)

        h = jnp.zeros((B, H), jnp.float32)           # h0 = 0 (PyTorch forward)
        c = jnp.zeros((B, H), jnp.float32)           # c0 = 0
        last_layer = layer == num_layers - 1

        for t in range(T):                           # fully unrolled, static idx
            g = gx_sc[t * B:(t + 1) * B, :] + jnp.dot(
                h, whh, preferred_element_type=jnp.float32)       # (B, 4H)
            i_g = jax.nn.sigmoid(g[:, 0 * H:1 * H])
            f_g = jax.nn.sigmoid(g[:, 1 * H:2 * H])
            g_g = jnp.tanh(g[:, 2 * H:3 * H])
            o_g = jax.nn.sigmoid(g[:, 3 * H:4 * H])
            c = f_g * c + i_g * g_g
            h = o_g * jnp.tanh(c)
            if not last_layer:                       # only non-final layers
                seq_sc[t * B:(t + 1) * B, :] = h     # feed the next layer

    # Fused FC on the last hidden state; lane-dense padded output.
    out_ref[...] = (jnp.dot(h, wfc_ref[...],
                            preferred_element_type=jnp.float32)
                    + bfc_ref[...]).astype(out_ref.dtype)


# ----------------------------------------------------------------------------
# Wrapper
# ----------------------------------------------------------------------------
_VMEM = pl.BlockSpec(memory_space=pltpu.MemorySpace.VMEM)


def lstm_model_forward(x, kparams, *, hidden_size, num_layers, output_size):
    """x: (B, T, input_size), batch_first like PyTorch. Returns (B, output_size)."""
    B, T, in_dim = x.shape
    H = hidden_size
    o_pad = kparams["fc"][0].shape[1]

    # time-major rows: row t*B + b holds x[b, t, :]
    x_tm = jnp.transpose(x, (1, 0, 2)).reshape(T * B, in_dim)

    inputs = [x_tm]
    for layer in range(num_layers):
        inputs.extend(kparams[f"lstm_l{layer}"])     # wih, whh, bias
    inputs.extend(kparams["fc"])                     # wfc, bfc

    kernel = functools.partial(_fused_lstm_fc_kernel, num_layers=num_layers,
                               hidden_size=H, seq_len=T, batch=B)
    out_pad = pl.pallas_call(
        kernel,
        out_shape=jax.ShapeDtypeStruct((B, o_pad), jnp.float32),
        in_specs=[_VMEM] * len(inputs),
        out_specs=_VMEM,
        scratch_shapes=[pltpu.VMEM((T * B, 4 * H), jnp.float32),   # gates_x
                        pltpu.VMEM((T * B, H), jnp.float32)],      # layer seq
    )(*inputs)
    return out_pad[:, :output_size]


# ----------------------------------------------------------------------------
# Parameter init (PyTorch layout / PyTorch-style uniform init) + one-time
# conversion to the kernel's MXU-friendly layout.
# ----------------------------------------------------------------------------
def init_params(key, input_size, hidden_size, num_layers, output_size):
    params = {}
    bound = 1.0 / jnp.sqrt(hidden_size)
    for layer in range(num_layers):
        in_dim = input_size if layer == 0 else hidden_size
        key, k1, k2, k3, k4 = jax.random.split(key, 5)
        params[f"lstm_l{layer}"] = (
            jax.random.uniform(k1, (4 * hidden_size, in_dim), jnp.float32,
                               -bound, bound),
            jax.random.uniform(k2, (4 * hidden_size, hidden_size), jnp.float32,
                               -bound, bound),
            jax.random.uniform(k3, (4 * hidden_size,), jnp.float32,
                               -bound, bound),
            jax.random.uniform(k4, (4 * hidden_size,), jnp.float32,
                               -bound, bound),
        )
    key, k1, k2 = jax.random.split(key, 3)
    params["fc"] = (
        jax.random.uniform(k1, (output_size, hidden_size), jnp.float32,
                           -bound, bound),
        jax.random.uniform(k2, (output_size,), jnp.float32, -bound, bound),
    )
    return params


def prepare_kernel_params(params, num_layers, output_size):
    """One-time layout conversion (done outside the hot forward path)."""
    kp = {}
    for layer in range(num_layers):
        w_ih, w_hh, b_ih, b_hh = params[f"lstm_l{layer}"]
        kp[f"lstm_l{layer}"] = (
            jnp.transpose(w_ih),               # (in_dim, 4H)
            jnp.transpose(w_hh),               # (H, 4H)
            (b_ih + b_hh)[None, :],            # (1, 4H)
        )
    w_fc, b_fc = params["fc"]                  # (O, H), (O,)
    o_pad = ((output_size + 127) // 128) * 128
    wfc = jnp.zeros((w_fc.shape[1], o_pad), jnp.float32)
    wfc = wfc.at[:, :output_size].set(jnp.transpose(w_fc))
    bfc = jnp.zeros((1, o_pad), jnp.float32).at[0, :output_size].set(b_fc)
    kp["fc"] = (wfc, bfc)
    return kp


# ----------------------------------------------------------------------------
# Pure-JAX reference (PyTorch nn.LSTM / nn.Linear semantics) for validation.
# ----------------------------------------------------------------------------
def _reference_forward(x, params, hidden_size, num_layers):
    B, T, _ = x.shape
    H = hidden_size
    layer_in = x
    for layer in range(num_layers):
        w_ih, w_hh, b_ih, b_hh = params[f"lstm_l{layer}"]
        h = jnp.zeros((B, H), jnp.float32)
        c = jnp.zeros((B, H), jnp.float32)
        outs = []
        for t in range(T):
            g = layer_in[:, t, :] @ w_ih.T + b_ih + h @ w_hh.T + b_hh
            i = jax.nn.sigmoid(g[:, :H])
            f = jax.nn.sigmoid(g[:, H:2 * H])
            gg = jnp.tanh(g[:, 2 * H:3 * H])
            o = jax.nn.sigmoid(g[:, 3 * H:])
            c = f * c + i * gg
            h = o * jnp.tanh(c)
            outs.append(h)
        layer_in = jnp.stack(outs, axis=1)
    w_fc, b_fc = params["fc"]
    return layer_in[:, -1, :] @ w_fc.T + b_fc


# ----------------------------------------------------------------------------
# Main
# ----------------------------------------------------------------------------
if __name__ == "__main__":
    BATCH = 2
    SEQ = 8
    INPUT_SIZE = 4
    HIDDEN_SIZE = 32
    NUM_LAYERS = 2
    OUTPUT_SIZE = 1

    key = jax.random.PRNGKey(0)
    key, xk = jax.random.split(key)
    x = jax.random.normal(xk, (BATCH, SEQ, INPUT_SIZE), jnp.float32)

    params = init_params(key, INPUT_SIZE, HIDDEN_SIZE, NUM_LAYERS, OUTPUT_SIZE)
    kparams = prepare_kernel_params(params, NUM_LAYERS, OUTPUT_SIZE)

    fwd = jax.jit(functools.partial(lstm_model_forward,
                                    hidden_size=HIDDEN_SIZE,
                                    num_layers=NUM_LAYERS,
                                    output_size=OUTPUT_SIZE))
    out = fwd(x, kparams)
    jax.block_until_ready(out)
    assert out.shape == (BATCH, OUTPUT_SIZE), out.shape

    ref = _reference_forward(x, params, HIDDEN_SIZE, NUM_LAYERS)
    assert jnp.allclose(out, ref, atol=1e-3, rtol=1e-3), (out, ref)

    print("KERNEL_OK")
</pallas_src>

<mosaic_0001>
module attributes {stable_mosaic.version = 11 : i64} {
  func.func @_fused_lstm_fc_kernel(%arg0: memref<16x4xf32, #tpu.memory_space<vmem>>, %arg1: memref<4x128xf32, #tpu.memory_space<vmem>>, %arg2: memref<32x128xf32, #tpu.memory_space<vmem>>, %arg3: memref<1x128xf32, #tpu.memory_space<vmem>>, %arg4: memref<32x128xf32, #tpu.memory_space<vmem>>, %arg5: memref<32x128xf32, #tpu.memory_space<vmem>>, %arg6: memref<1x128xf32, #tpu.memory_space<vmem>>, %arg7: memref<32x128xf32, #tpu.memory_space<vmem>>, %arg8: memref<1x128xf32, #tpu.memory_space<vmem>>, %arg9: memref<2x128xf32, #tpu.memory_space<vmem>>, %arg10: memref<16x128xf32, #tpu.memory_space<vmem>>, %arg11: memref<16x32xf32, #tpu.memory_space<vmem>>) attributes {dimension_semantics = [], scalar_prefetch = 0 : i64, scratch_operands = 2 : i64, tpu.core_type = #tpu.core_type<tc>} {
    %c0 = arith.constant 0 : index
    %c0_0 = arith.constant 0 : index
    %0 = vector.load %arg1[%c0, %c0_0] : memref<4x128xf32, #tpu.memory_space<vmem>>, vector<4x128xf32>
    %c0_1 = arith.constant 0 : index
    %c0_2 = arith.constant 0 : index
    %1 = vector.load %arg2[%c0_1, %c0_2] : memref<32x128xf32, #tpu.memory_space<vmem>>, vector<32x128xf32>
    %c0_3 = arith.constant 0 : index
    %c0_4 = arith.constant 0 : index
    %2 = vector.load %arg3[%c0_3, %c0_4] : memref<1x128xf32, #tpu.memory_space<vmem>>, vector<1x128xf32>
    %c0_5 = arith.constant 0 : index
    %c0_6 = arith.constant 0 : index
    %3 = vector.load %arg0[%c0_5, %c0_6] : memref<16x4xf32, #tpu.memory_space<vmem>>, vector<16x4xf32>
    %cst = arith.constant dense<0.000000e+00> : vector<16x128xf32>
    %4 = tpu.matmul %3, %0, %cst {dimension_numbers = #tpu.dot_dimension_numbers<[1], [0], [0], [1], [0, 0, 1, 1], [], []>} : vector<16x4xf32>, vector<4x128xf32>, vector<16x128xf32> -> vector<16x128xf32>
    %5 = vector.broadcast %2 : vector<1x128xf32> to vector<16x128xf32>
    %6 = arith.addf %4, %5 : vector<16x128xf32>
    %c0_7 = arith.constant 0 : index
    %c0_8 = arith.constant 0 : index
    %7 = vector.load %arg10[%c0_7, %c0_8] : memref<16x128xf32, #tpu.memory_space<vmem>>, vector<16x128xf32>
    tpu.vector_store %arg10[%c0_7, %c0_8], %6 {strides = array<i32>} : memref<16x128xf32, #tpu.memory_space<vmem>>, vector<16x128xf32>,
    %cst_9 = arith.constant 0.000000e+00 : f32
    %8 = vector.broadcast %cst_9 : f32 to vector<2x32xf32>
    %cst_10 = arith.constant 0.000000e+00 : f32
    %9 = vector.broadcast %cst_10 : f32 to vector<2x32xf32>
    %c0_11 = arith.constant 0 : index
    %c0_12 = arith.constant 0 : index
    %10 = vector.load %arg10[%c0_11, %c0_12] : memref<16x128xf32, #tpu.memory_space<vmem>>, vector<2x128xf32>
    %cst_13 = arith.constant dense<0.000000e+00> : vector<2x128xf32>
    %11 = tpu.matmul %8, %1, %cst_13 {dimension_numbers = #tpu.dot_dimension_numbers<[1], [0], [0], [1], [0, 0, 1, 1], [], []>} : vector<2x32xf32>, vector<32x128xf32>, vector<2x128xf32> -> vector<2x128xf32>
    %12 = arith.addf %10, %11 : vector<2x128xf32>
    %13 = vector.extract_strided_slice %12 {offsets = [0, 0], sizes = [2, 32], strides = [1, 1]} : vector<2x128xf32> to vector<2x32xf32>
    %14 = arith.negf %13 : vector<2x32xf32>
    %15 = math.exp %14 : vector<2x32xf32>
    %cst_14 = arith.constant 1.000000e+00 : f32
    %16 = vector.broadcast %cst_14 : f32 to vector<2x32xf32>
    %17 = arith.addf %16, %15 : vector<2x32xf32>
    %18 = arith.divf %16, %17 : vector<2x32xf32>
    %19 = vector.extract_strided_slice %12 {offsets = [0, 32], sizes = [2, 32], strides = [1, 1]} : vector<2x128xf32> to vector<2x32xf32>
    %20 = arith.negf %19 : vector<2x32xf32>
    %21 = math.exp %20 : vector<2x32xf32>
    %cst_15 = arith.constant 1.000000e+00 : f32
    %22 = vector.broadcast %cst_15 : f32 to vector<2x32xf32>
    %23 = arith.addf %22, %21 : vector<2x32xf32>
    %24 = arith.divf %22, %23 : vector<2x32xf32>
    %25 = vector.extract_strided_slice %12 {offsets = [0, 64], sizes = [2, 32], strides = [1, 1]} : vector<2x128xf32> to vector<2x32xf32>
    %26 = math.tanh %25 : vector<2x32xf32>
    %27 = vector.extract_strided_slice %12 {offsets = [0, 96], sizes = [2, 32], strides = [1, 1]} : vector<2x128xf32> to vector<2x32xf32>
    %28 = arith.negf %27 : vector<2x32xf32>
    %29 = math.exp %28 : vector<2x32xf32>
    %cst_16 = arith.constant 1.000000e+00 : f32
    %30 = vector.broadcast %cst_16 : f32 to vector<2x32xf32>
    %31 = arith.addf %30, %29 : vector<2x32xf32>
    %32 = arith.divf %30, %31 : vector<2x32xf32>
    %33 = arith.mulf %24, %9 : vector<2x32xf32>
    %34 = arith.mulf %18, %26 : vector<2x32xf32>
    %35 = arith.addf %33, %34 : vector<2x32xf32>
    %36 = math.tanh %35 : vector<2x32xf32>
    %37 = arith.mulf %32, %36 : vector<2x32xf32>
    %c0_17 = arith.constant 0 : index
    %c0_18 = arith.constant 0 : index
    %38 = vector.load %arg11[%c0_17, %c0_18] : memref<16x32xf32, #tpu.memory_space<vmem>>, vector<2x32xf32>
    tpu.vector_store %arg11[%c0_17, %c0_18], %37 {strides = array<i32>} : memref<16x32xf32, #tpu.memory_space<vmem>>, vector<2x32xf32>,
    %c2 = arith.constant 2 : index
    %c0_19 = arith.constant 0 : index
    %39 = vector.load %arg10[%c2, %c0_19] : memref<16x128xf32, #tpu.memory_space<vmem>>, vector<2x128xf32>
    %cst_20 = arith.constant dense<0.000000e+00> : vector<2x128xf32>
    %40 = tpu.matmul %37, %1, %cst_20 {dimension_numbers = #tpu.dot_dimension_numbers<[1], [0], [0], [1], [0, 0, 1, 1], [], []>} : vector<2x32xf32>, vector<32x128xf32>, vector<2x128xf32> -> vector<2x128xf32>
    %41 = arith.addf %39, %40 : vector<2x128xf32>
    %42 = vector.extract_strided_slice %41 {offsets = [0, 0], sizes = [2, 32], strides = [1, 1]} : vector<2x128xf32> to vector<2x32xf32>
    %43 = arith.negf %42 : vector<2x32xf32>
    %44 = math.exp %43 : vector<2x32xf32>
    %cst_21 = arith.constant 1.000000e+00 : f32
    %45 = vector.broadcast %cst_21 : f32 to vector<2x32xf32>
    %46 = arith.addf %45, %44 : vector<2x32xf32>
    %47 = arith.divf %45, %46 : vector<2x32xf32>
    %48 = vector.extract_strided_slice %41 {offsets = [0, 32], sizes = [2, 32], strides = [1, 1]} : vector<2x128xf32> to vector<2x32xf32>
    %49 = arith.negf %48 : vector<2x32xf32>
    %50 = math.exp %49 : vector<2x32xf32>
    %cst_22 = arith.constant 1.000000e+00 : f32
    %51 = vector.broadcast %cst_22 : f32 to vector<2x32xf32>
    %52 = arith.addf %51, %50 : vector<2x32xf32>
    %53 = arith.divf %51, %52 : vector<2x32xf32>
    %54 = vector.extract_strided_slice %41 {offsets = [0, 64], sizes = [2, 32], strides = [1, 1]} : vector<2x128xf32> to vector<2x32xf32>
    %55 = math.tanh %54 : vector<2x32xf32>
    %56 = vector.extract_strided_slice %41 {offsets = [0, 96], sizes = [2, 32], strides = [1, 1]} : vector<2x128xf32> to vector<2x32xf32>
    %57 = arith.negf %56 : vector<2x32xf32>
    %58 = math.exp %57 : vector<2x32xf32>
    %cst_23 = arith.constant 1.000000e+00 : f32
    %59 = vector.broadcast %cst_23 : f32 to vector<2x32xf32>
    %60 = arith.addf %59, %58 : vector<2x32xf32>
    %61 = arith.divf %59, %60 : vector<2x32xf32>
    %62 = arith.mulf %53, %35 : vector<2x32xf32>
    %63 = arith.mulf %47, %55 : vector<2x32xf32>
    %64 = arith.addf %62, %63 : vector<2x32xf32>
    %65 = math.tanh %64 : vector<2x32xf32>
    %66 = arith.mulf %61, %65 : vector<2x32xf32>
    %c2_24 = arith.constant 2 : index
    %c0_25 = arith.constant 0 : index
    %67 = vector.load %arg11[%c2_24, %c0_25] : memref<16x32xf32, #tpu.memory_space<vmem>>, vector<2x32xf32>
    tpu.vector_store %arg11[%c2_24, %c0_25], %66 {strides = array<i32>} : memref<16x32xf32, #tpu.memory_space<vmem>>, vector<2x32xf32>,
    %c4 = arith.constant 4 : index
    %c0_26 = arith.constant 0 : index
    %68 = vector.load %arg10[%c4, %c0_26] : memref<16x128xf32, #tpu.memory_space<vmem>>, vector<2x128xf32>
    %cst_27 = arith.constant dense<0.000000e+00> : vector<2x128xf32>
    %69 = tpu.matmul %66, %1, %cst_27 {dimension_numbers = #tpu.dot_dimension_numbers<[1], [0], [0], [1], [0, 0, 1, 1], [], []>} : vector<2x32xf32>, vector<32x128xf32>, vector<2x128xf32> -> vector<2x128xf32>
    %70 = arith.addf %68, %69 : vector<2x128xf32>
    %71 = vector.extract_strided_slice %70 {offsets = [0, 0], sizes = [2, 32], strides = [1, 1]} : vector<2x128xf32> to vector<2x32xf32>
    %72 = arith.negf %71 : vector<2x32xf32>
    %73 = math.exp %72 : vector<2x32xf32>
    %cst_28 = arith.constant 1.000000e+00 : f32
    %74 = vector.broadcast %cst_28 : f32 to vector<2x32xf32>
    %75 = arith.addf %74, %73 : vector<2x32xf32>
    %76 = arith.divf %74, %75 : vector<2x32xf32>
    %77 = vector.extract_strided_slice %70 {offsets = [0, 32], sizes = [2, 32], strides = [1, 1]} : vector<2x128xf32> to vector<2x32xf32>
    %78 = arith.negf %77 : vector<2x32xf32>
    %79 = math.exp %78 : vector<2x32xf32>
    %cst_29 = arith.constant 1.000000e+00 : f32
    %80 = vector.broadcast %cst_29 : f32 to vector<2x32xf32>
    %81 = arith.addf %80, %79 : vector<2x32xf32>
    %82 = arith.divf %80, %81 : vector<2x32xf32>
    %83 = vector.extract_strided_slice %70 {offsets = [0, 64], sizes = [2, 32], strides = [1, 1]} : vector<2x128xf32> to vector<2x32xf32>
    %84 = math.tanh %83 : vector<2x32xf32>
    %85 = vector.extract_strided_slice %70 {offsets = [0, 96], sizes = [2, 32], strides = [1, 1]} : vector<2x128xf32> to vector<2x32xf32>
    %86 = arith.negf %85 : vector<2x32xf32>
    %87 = math.exp %86 : vector<2x32xf32>
    %cst_30 = arith.constant 1.000000e+00 : f32
    %88 = vector.broadcast %cst_30 : f32 to vector<2x32xf32>
    %89 = arith.addf %88, %87 : vector<2x32xf32>
    %90 = arith.divf %88, %89 : vector<2x32xf32>
    %91 = arith.mulf %82, %64 : vector<2x32xf32>
    %92 = arith.mulf %76, %84 : vector<2x32xf32>
    %93 = arith.addf %91, %92 : vector<2x32xf32>
    %94 = math.tanh %93 : vector<2x32xf32>
    %95 = arith.mulf %90, %94 : vector<2x32xf32>
    %c4_31 = arith.constant 4 : index
    %c0_32 = arith.constant 0 : index
    %96 = vector.load %arg11[%c4_31, %c0_32] : memref<16x32xf32, #tpu.memory_space<vmem>>, vector<2x32xf32>
    tpu.vector_store %arg11[%c4_31, %c0_32], %95 {strides = array<i32>} : memref<16x32xf32, #tpu.memory_space<vmem>>, vector<2x32xf32>,
    %c6 = arith.constant 6 : index
    %c0_33 = arith.constant 0 : index
    %97 = vector.load %arg10[%c6, %c0_33] : memref<16x128xf32, #tpu.memory_space<vmem>>, vector<2x128xf32>
    %cst_34 = arith.constant dense<0.000000e+00> : vector<2x128xf32>
    %98 = tpu.matmul %95, %1, %cst_34 {dimension_numbers = #tpu.dot_dimension_numbers<[1], [0], [0], [1], [0, 0, 1, 1], [], []>} : vector<2x32xf32>, vector<32x128xf32>, vector<2x128xf32> -> vector<2x128xf32>
    %99 = arith.addf %97, %98 : vector<2x128xf32>
    %100 = vector.extract_strided_slice %99 {offsets = [0, 0], sizes = [2, 32], strides = [1, 1]} : vector<2x128xf32> to vector<2x32xf32>
    %101 = arith.negf %100 : vector<2x32xf32>
    %102 = math.exp %101 : vector<2x32xf32>
    %cst_35 = arith.constant 1.000000e+00 : f32
    %103 = vector.broadcast %cst_35 : f32 to vector<2x32xf32>
    %104 = arith.addf %103, %102 : vector<2x32xf32>
    %105 = arith.divf %103, %104 : vector<2x32xf32>
    %106 = vector.extract_strided_slice %99 {offsets = [0, 32], sizes = [2, 32], strides = [1, 1]} : vector<2x128xf32> to vector<2x32xf32>
    %107 = arith.negf %106 : vector<2x32xf32>
    %108 = math.exp %107 : vector<2x32xf32>
    %cst_36 = arith.constant 1.000000e+00 : f32
    %109 = vector.broadcast %cst_36 : f32 to vector<2x32xf32>
    %110 = arith.addf %109, %108 : vector<2x32xf32>
    %111 = arith.divf %109, %110 : vector<2x32xf32>
    %112 = vector.extract_strided_slice %99 {offsets = [0, 64], sizes = [2, 32], strides = [1, 1]} : vector<2x128xf32> to vector<2x32xf32>
    %113 = math.tanh %112 : vector<2x32xf32>
    %114 = vector.extract_strided_slice %99 {offsets = [0, 96], sizes = [2, 32], strides = [1, 1]} : vector<2x128xf32> to vector<2x32xf32>
    %115 = arith.negf %114 : vector<2x32xf32>
    %116 = math.exp %115 : vector<2x32xf32>
    %cst_37 = arith.constant 1.000000e+00 : f32
    %117 = vector.broadcast %cst_37 : f32 to vector<2x32xf32>
    %118 = arith.addf %117, %116 : vector<2x32xf32>
    %119 = arith.divf %117, %118 : vector<2x32xf32>
    %120 = arith.mulf %111, %93 : vector<2x32xf32>
    %121 = arith.mulf %105, %113 : vector<2x32xf32>
    %122 = arith.addf %120, %121 : vector<2x32xf32>
    %123 = math.tanh %122 : vector<2x32xf32>
    %124 = arith.mulf %119, %123 : vector<2x32xf32>
    %c6_38 = arith.constant 6 : index
    %c0_39 = arith.constant 0 : index
    %125 = vector.load %arg11[%c6_38, %c0_39] : memref<16x32xf32, #tpu.memory_space<vmem>>, vector<2x32xf32>
    tpu.vector_store %arg11[%c6_38, %c0_39], %124 {strides = array<i32>} : memref<16x32xf32, #tpu.memory_space<vmem>>, vector<2x32xf32>,
    %c8 = arith.constant 8 : index
    %c0_40 = arith.constant 0 : index
    %126 = vector.load %arg10[%c8, %c0_40] : memref<16x128xf32, #tpu.memory_space<vmem>>, vector<2x128xf32>
    %cst_41 = arith.constant dense<0.000000e+00> : vector<2x128xf32>
    %127 = tpu.matmul %124, %1, %cst_41 {dimension_numbers = #tpu.dot_dimension_numbers<[1], [0], [0], [1], [0, 0, 1, 1], [], []>} : vector<2x32xf32>, vector<32x128xf32>, vector<2x128xf32> -> vector<2x128xf32>
    %128 = arith.addf %126, %127 : vector<2x128xf32>
    %129 = vector.extract_strided_slice %128 {offsets = [0, 0], sizes = [2, 32], strides = [1, 1]} : vector<2x128xf32> to vector<2x32xf32>
    %130 = arith.negf %129 : vector<2x32xf32>
    %131 = math.exp %130 : vector<2x32xf32>
    %cst_42 = arith.constant 1.000000e+00 : f32
    %132 = vector.broadcast %cst_42 : f32 to vector<2x32xf32>
    %133 = arith.addf %132, %131 : vector<2x32xf32>
    %134 = arith.divf %132, %133 : vector<2x32xf32>
    %135 = vector.extract_strided_slice %128 {offsets = [0, 32], sizes = [2, 32], strides = [1, 1]} : vector<2x128xf32> to vector<2x32xf32>
    %136 = arith.negf %135 : vector<2x32xf32>
    %137 = math.exp %136 : vector<2x32xf32>
    %cst_43 = arith.constant 1.000000e+00 : f32
    %138 = vector.broadcast %cst_43 : f32 to vector<2x32xf32>
    %139 = arith.addf %138, %137 : vector<2x32xf32>
    %140 = arith.divf %138, %139 : vector<2x32xf32>
    %141 = vector.extract_strided_slice %128 {offsets = [0, 64], sizes = [2, 32], strides = [1, 1]} : vector<2x128xf32> to vector<2x32xf32>
    %142 = math.tanh %141 : vector<2x32xf32>
    %143 = vector.extract_strided_slice %128 {offsets = [0, 96], sizes = [2, 32], strides = [1, 1]} : vector<2x128xf32> to vector<2x32xf32>
    %144 = arith.negf %143 : vector<2x32xf32>
    %145 = math.exp %144 : vector<2x32xf32>
    %cst_44 = arith.constant 1.000000e+00 : f32
    %146 = vector.broadcast %cst_44 : f32 to vector<2x32xf32>
    %147 = arith.addf %146, %145 : vector<2x32xf32>
    %148 = arith.divf %146, %147 : vector<2x32xf32>
    %149 = arith.mulf %140, %122 : vector<2x32xf32>
    %150 = arith.mulf %134, %142 : vector<2x32xf32>
    %151 = arith.addf %149, %150 : vector<2x32xf32>
    %152 = math.tanh %151 : vector<2x32xf32>
    %153 = arith.mulf %148, %152 : vector<2x32xf32>
    %c8_45 = arith.constant 8 : index
    %c0_46 = arith.constant 0 : index
    %154 = vector.load %arg11[%c8_45, %c0_46] : memref<16x32xf32, #tpu.memory_space<vmem>>, vector<2x32xf32>
    tpu.vector_store %arg11[%c8_45, %c0_46], %153 {strides = array<i32>} : memref<16x32xf32, #tpu.memory_space<vmem>>, vector<2x32xf32>,
    %c10 = arith.constant 10 : index
    %c0_47 = arith.constant 0 : index
    %155 = vector.load %arg10[%c10, %c0_47] : memref<16x128xf32, #tpu.memory_space<vmem>>, vector<2x128xf32>
    %cst_48 = arith.constant dense<0.000000e+00> : vector<2x128xf32>
    %156 = tpu.matmul %153, %1, %cst_48 {dimension_numbers = #tpu.dot_dimension_numbers<[1], [0], [0], [1], [0, 0, 1, 1], [], []>} : vector<2x32xf32>, vector<32x128xf32>, vector<2x128xf32> -> vector<2x128xf32>
    %157 = arith.addf %155, %156 : vector<2x128xf32>
    %158 = vector.extract_strided_slice %157 {offsets = [0, 0], sizes = [2, 32], strides = [1, 1]} : vector<2x128xf32> to vector<2x32xf32>
    %159 = arith.negf %158 : vector<2x32xf32>
    %160 = math.exp %159 : vector<2x32xf32>
    %cst_49 = arith.constant 1.000000e+00 : f32
    %161 = vector.broadcast %cst_49 : f32 to vector<2x32xf32>
    %162 = arith.addf %161, %160 : vector<2x32xf32>
    %163 = arith.divf %161, %162 : vector<2x32xf32>
    %164 = vector.extract_strided_slice %157 {offsets = [0, 32], sizes = [2, 32], strides = [1, 1]} : vector<2x128xf32> to vector<2x32xf32>
    %165 = arith.negf %164 : vector<2x32xf32>
    %166 = math.exp %165 : vector<2x32xf32>
    %cst_50 = arith.constant 1.000000e+00 : f32
    %167 = vector.broadcast %cst_50 : f32 to vector<2x32xf32>
    %168 = arith.addf %167, %166 : vector<2x32xf32>
    %169 = arith.divf %167, %168 : vector<2x32xf32>
    %170 = vector.extract_strided_slice %157 {offsets = [0, 64], sizes = [2, 32], strides = [1, 1]} : vector<2x128xf32> to vector<2x32xf32>
    %171 = math.tanh %170 : vector<2x32xf32>
    %172 = vector.extract_strided_slice %157 {offsets = [0, 96], sizes = [2, 32], strides = [1, 1]} : vector<2x128xf32> to vector<2x32xf32>
    %173 = arith.negf %172 : vector<2x32xf32>
    %174 = math.exp %173 : vector<2x32xf32>
    %cst_51 = arith.constant 1.000000e+00 : f32
    %175 = vector.broadcast %cst_51 : f32 to vector<2x32xf32>
    %176 = arith.addf %175, %174 : vector<2x32xf32>
    %177 = arith.divf %175, %176 : vector<2x32xf32>
    %178 = arith.mulf %169, %151 : vector<2x32xf32>
    %179 = arith.mulf %163, %171 : vector<2x32xf32>
    %180 = arith.addf %178, %179 : vector<2x32xf32>
    %181 = math.tanh %180 : vector<2x32xf32>
    %182 = arith.mulf %177, %181 : vector<2x32xf32>
    %c10_52 = arith.constant 10 : index
    %c0_53 = arith.constant 0 : index
    %183 = vector.load %arg11[%c10_52, %c0_53] : memref<16x32xf32, #tpu.memory_space<vmem>>, vector<2x32xf32>
    tpu.vector_store %arg11[%c10_52, %c0_53], %182 {strides = array<i32>} : memref<16x32xf32, #tpu.memory_space<vmem>>, vector<2x32xf32>,
    %c12 = arith.constant 12 : index
    %c0_54 = arith.constant 0 : index
    %184 = vector.load %arg10[%c12, %c0_54] : memref<16x128xf32, #tpu.memory_space<vmem>>, vector<2x128xf32>
    %cst_55 = arith.constant dense<0.000000e+00> : vector<2x128xf32>
    %185 = tpu.matmul %182, %1, %cst_55 {dimension_numbers = #tpu.dot_dimension_numbers<[1], [0], [0], [1], [0, 0, 1, 1], [], []>} : vector<2x32xf32>, vector<32x128xf32>, vector<2x128xf32> -> vector<2x128xf32>
    %186 = arith.addf %184, %185 : vector<2x128xf32>
    %187 = vector.extract_strided_slice %186 {offsets = [0, 0], sizes = [2, 32], strides = [1, 1]} : vector<2x128xf32> to vector<2x32xf32>
    %188 = arith.negf %187 : vector<2x32xf32>
    %189 = math.exp %188 : vector<2x32xf32>
    %cst_56 = arith.constant 1.000000e+00 : f32
    %190 = vector.broadcast %cst_56 : f32 to vector<2x32xf32>
    %191 = arith.addf %190, %189 : vector<2x32xf32>
    %192 = arith.divf %190, %191 : vector<2x32xf32>
    %193 = vector.extract_strided_slice %186 {offsets = [0, 32], sizes = [2, 32], strides = [1, 1]} : vector<2x128xf32> to vector<2x32xf32>
    %194 = arith.negf %193 : vector<2x32xf32>
    %195 = math.exp %194 : vector<2x32xf32>
    %cst_57 = arith.constant 1.000000e+00 : f32
    %196 = vector.broadcast %cst_57 : f32 to vector<2x32xf32>
    %197 = arith.addf %196, %195 : vector<2x32xf32>
    %198 = arith.divf %196, %197 : vector<2x32xf32>
    %199 = vector.extract_strided_slice %186 {offsets = [0, 64], sizes = [2, 32], strides = [1, 1]} : vector<2x128xf32> to vector<2x32xf32>
    %200 = math.tanh %199 : vector<2x32xf32>
    %201 = vector.extract_strided_slice %186 {offsets = [0, 96], sizes = [2, 32], strides = [1, 1]} : vector<2x128xf32> to vector<2x32xf32>
    %202 = arith.negf %201 : vector<2x32xf32>
    %203 = math.exp %202 : vector<2x32xf32>
    %cst_58 = arith.constant 1.000000e+00 : f32
    %204 = vector.broadcast %cst_58 : f32 to vector<2x32xf32>
    %205 = arith.addf %204, %203 : vector<2x32xf32>
    %206 = arith.divf %204, %205 : vector<2x32xf32>
    %207 = arith.mulf %198, %180 : vector<2x32xf32>
    %208 = arith.mulf %192, %200 : vector<2x32xf32>
    %209 = arith.addf %207, %208 : vector<2x32xf32>
    %210 = math.tanh %209 : vector<2x32xf32>
    %211 = arith.mulf %206, %210 : vector<2x32xf32>
    %c12_59 = arith.constant 12 : index
    %c0_60 = arith.constant 0 : index
    %212 = vector.load %arg11[%c12_59, %c0_60] : memref<16x32xf32, #tpu.memory_space<vmem>>, vector<2x32xf32>
    tpu.vector_store %arg11[%c12_59, %c0_60], %211 {strides = array<i32>} : memref<16x32xf32, #tpu.memory_space<vmem>>, vector<2x32xf32>,
    %c14 = arith.constant 14 : index
    %c0_61 = arith.constant 0 : index
    %213 = vector.load %arg10[%c14, %c0_61] : memref<16x128xf32, #tpu.memory_space<vmem>>, vector<2x128xf32>
    %cst_62 = arith.constant dense<0.000000e+00> : vector<2x128xf32>
    %214 = tpu.matmul %211, %1, %cst_62 {dimension_numbers = #tpu.dot_dimension_numbers<[1], [0], [0], [1], [0, 0, 1, 1], [], []>} : vector<2x32xf32>, vector<32x128xf32>, vector<2x128xf32> -> vector<2x128xf32>
    %215 = arith.addf %213, %214 : vector<2x128xf32>
    %216 = vector.extract_strided_slice %215 {offsets = [0, 0], sizes = [2, 32], strides = [1, 1]} : vector<2x128xf32> to vector<2x32xf32>
    %217 = arith.negf %216 : vector<2x32xf32>
    %218 = math.exp %217 : vector<2x32xf32>
    %cst_63 = arith.constant 1.000000e+00 : f32
    %219 = vector.broadcast %cst_63 : f32 to vector<2x32xf32>
    %220 = arith.addf %219, %218 : vector<2x32xf32>
    %221 = arith.divf %219, %220 : vector<2x32xf32>
    %222 = vector.extract_strided_slice %215 {offsets = [0, 32], sizes = [2, 32], strides = [1, 1]} : vector<2x128xf32> to vector<2x32xf32>
    %223 = arith.negf %222 : vector<2x32xf32>
    %224 = math.exp %223 : vector<2x32xf32>
    %cst_64 = arith.constant 1.000000e+00 : f32
    %225 = vector.broadcast %cst_64 : f32 to vector<2x32xf32>
    %226 = arith.addf %225, %224 : vector<2x32xf32>
    %227 = arith.divf %225, %226 : vector<2x32xf32>
    %228 = vector.extract_strided_slice %215 {offsets = [0, 64], sizes = [2, 32], strides = [1, 1]} : vector<2x128xf32> to vector<2x32xf32>
    %229 = math.tanh %228 : vector<2x32xf32>
    %230 = vector.extract_strided_slice %215 {offsets = [0, 96], sizes = [2, 32], strides = [1, 1]} : vector<2x128xf32> to vector<2x32xf32>
    %231 = arith.negf %230 : vector<2x32xf32>
    %232 = math.exp %231 : vector<2x32xf32>
    %cst_65 = arith.constant 1.000000e+00 : f32
    %233 = vector.broadcast %cst_65 : f32 to vector<2x32xf32>
    %234 = arith.addf %233, %232 : vector<2x32xf32>
    %235 = arith.divf %233, %234 : vector<2x32xf32>
    %236 = arith.mulf %227, %209 : vector<2x32xf32>
    %237 = arith.mulf %221, %229 : vector<2x32xf32>
    %238 = arith.addf %236, %237 : vector<2x32xf32>
    %239 = math.tanh %238 : vector<2x32xf32>
    %240 = arith.mulf %235, %239 : vector<2x32xf32>
    %c14_66 = arith.constant 14 : index
    %c0_67 = arith.constant 0 : index
    %241 = vector.load %arg11[%c14_66, %c0_67] : memref<16x32xf32, #tpu.memory_space<vmem>>, vector<2x32xf32>
    tpu.vector_store %arg11[%c14_66, %c0_67], %240 {strides = array<i32>} : memref<16x32xf32, #tpu.memory_space<vmem>>, vector<2x32xf32>,
    %c0_68 = arith.constant 0 : index
    %c0_69 = arith.constant 0 : index
    %242 = vector.load %arg4[%c0_68, %c0_69] : memref<32x128xf32, #tpu.memory_space<vmem>>, vector<32x128xf32>
    %c0_70 = arith.constant 0 : index
    %c0_71 = arith.constant 0 : index
    %243 = vector.load %arg5[%c0_70, %c0_71] : memref<32x128xf32, #tpu.memory_space<vmem>>, vector<32x128xf32>
    %c0_72 = arith.constant 0 : index
    %c0_73 = arith.constant 0 : index
    %244 = vector.load %arg6[%c0_72, %c0_73] : memref<1x128xf32, #tpu.memory_space<vmem>>, vector<1x128xf32>
    %c0_74 = arith.constant 0 : index
    %c0_75 = arith.constant 0 : index
    %245 = vector.load %arg11[%c0_74, %c0_75] : memref<16x32xf32, #tpu.memory_space<vmem>>, vector<16x32xf32>
    %cst_76 = arith.constant dense<0.000000e+00> : vector<16x128xf32>
    %246 = tpu.matmul %245, %242, %cst_76 {dimension_numbers = #tpu.dot_dimension_numbers<[1], [0], [0], [1], [0, 0, 1, 1], [], []>} : vector<16x32xf32>, vector<32x128xf32>, vector<16x128xf32> -> vector<16x128xf32>
    %247 = vector.broadcast %244 : vector<1x128xf32> to vector<16x128xf32>
    %248 = arith.addf %246, %247 : vector<16x128xf32>
    %c0_77 = arith.constant 0 : index
    %c0_78 = arith.constant 0 : index
    %249 = vector.load %arg10[%c0_77, %c0_78] : memref<16x128xf32, #tpu.memory_space<vmem>>, vector<16x128xf32>
    tpu.vector_store %arg10[%c0_77, %c0_78], %248 {strides = array<i32>} : memref<16x128xf32, #tpu.memory_space<vmem>>, vector<16x128xf32>,
    %cst_79 = arith.constant 0.000000e+00 : f32
    %250 = vector.broadcast %cst_79 : f32 to vector<2x32xf32>
    %cst_80 = arith.constant 0.000000e+00 : f32
    %251 = vector.broadcast %cst_80 : f32 to vector<2x32xf32>
    %c0_81 = arith.constant 0 : index
    %c0_82 = arith.constant 0 : index
    %252 = vector.load %arg10[%c0_81, %c0_82] : memref<16x128xf32, #tpu.memory_space<vmem>>, vector<2x128xf32>
    %cst_83 = arith.constant dense<0.000000e+00> : vector<2x128xf32>
    %253 = tpu.matmul %250, %243, %cst_83 {dimension_numbers = #tpu.dot_dimension_numbers<[1], [0], [0], [1], [0, 0, 1, 1], [], []>} : vector<2x32xf32>, vector<32x128xf32>, vector<2x128xf32> -> vector<2x128xf32>
    %254 = arith.addf %252, %253 : vector<2x128xf32>
    %255 = vector.extract_strided_slice %254 {offsets = [0, 0], sizes = [2, 32], strides = [1, 1]} : vector<2x128xf32> to vector<2x32xf32>
    %256 = arith.negf %255 : vector<2x32xf32>
    %257 = math.exp %256 : vector<2x32xf32>
    %cst_84 = arith.constant 1.000000e+00 : f32
    %258 = vector.broadcast %cst_84 : f32 to vector<2x32xf32>
    %259 = arith.addf %258, %257 : vector<2x32xf32>
    %260 = arith.divf %258, %259 : vector<2x32xf32>
    %261 = vector.extract_strided_slice %254 {offsets = [0, 32], sizes = [2, 32], strides = [1, 1]} : vector<2x128xf32> to vector<2x32xf32>
    %262 = arith.negf %261 : vector<2x32xf32>
    %263 = math.exp %262 : vector<2x32xf32>
    %cst_85 = arith.constant 1.000000e+00 : f32
    %264 = vector.broadcast %cst_85 : f32 to vector<2x32xf32>
    %265 = arith.addf %264, %263 : vector<2x32xf32>
    %266 = arith.divf %264, %265 : vector<2x32xf32>
    %267 = vector.extract_strided_slice %254 {offsets = [0, 64], sizes = [2, 32], strides = [1, 1]} : vector<2x128xf32> to vector<2x32xf32>
    %268 = math.tanh %267 : vector<2x32xf32>
    %269 = vector.extract_strided_slice %254 {offsets = [0, 96], sizes = [2, 32], strides = [1, 1]} : vector<2x128xf32> to vector<2x32xf32>
    %270 = arith.negf %269 : vector<2x32xf32>
    %271 = math.exp %270 : vector<2x32xf32>
    %cst_86 = arith.constant 1.000000e+00 : f32
    %272 = vector.broadcast %cst_86 : f32 to vector<2x32xf32>
    %273 = arith.addf %272, %271 : vector<2x32xf32>
    %274 = arith.divf %272, %273 : vector<2x32xf32>
    %275 = arith.mulf %266, %251 : vector<2x32xf32>
    %276 = arith.mulf %260, %268 : vector<2x32xf32>
    %277 = arith.addf %275, %276 : vector<2x32xf32>
    %278 = math.tanh %277 : vector<2x32xf32>
    %279 = arith.mulf %274, %278 : vector<2x32xf32>
    %c2_87 = arith.constant 2 : index
    %c0_88 = arith.constant 0 : index
    %280 = vector.load %arg10[%c2_87, %c0_88] : memref<16x128xf32, #tpu.memory_space<vmem>>, vector<2x128xf32>
    %cst_89 = arith.constant dense<0.000000e+00> : vector<2x128xf32>
    %281 = tpu.matmul %279, %243, %cst_89 {dimension_numbers = #tpu.dot_dimension_numbers<[1], [0], [0], [1], [0, 0, 1, 1], [], []>} : vector<2x32xf32>, vector<32x128xf32>, vector<2x128xf32> -> vector<2x128xf32>
    %282 = arith.addf %280, %281 : vector<2x128xf32>
    %283 = vector.extract_strided_slice %282 {offsets = [0, 0], sizes = [2, 32], strides = [1, 1]} : vector<2x128xf32> to vector<2x32xf32>
    %284 = arith.negf %283 : vector<2x32xf32>
    %285 = math.exp %284 : vector<2x32xf32>
    %cst_90 = arith.constant 1.000000e+00 : f32
    %286 = vector.broadcast %cst_90 : f32 to vector<2x32xf32>
    %287 = arith.addf %286, %285 : vector<2x32xf32>
    %288 = arith.divf %286, %287 : vector<2x32xf32>
    %289 = vector.extract_strided_slice %282 {offsets = [0, 32], sizes = [2, 32], strides = [1, 1]} : vector<2x128xf32> to vector<2x32xf32>
    %290 = arith.negf %289 : vector<2x32xf32>
    %291 = math.exp %290 : vector<2x32xf32>
    %cst_91 = arith.constant 1.000000e+00 : f32
    %292 = vector.broadcast %cst_91 : f32 to vector<2x32xf32>
    %293 = arith.addf %292, %291 : vector<2x32xf32>
    %294 = arith.divf %292, %293 : vector<2x32xf32>
    %295 = vector.extract_strided_slice %282 {offsets = [0, 64], sizes = [2, 32], strides = [1, 1]} : vector<2x128xf32> to vector<2x32xf32>
    %296 = math.tanh %295 : vector<2x32xf32>
    %297 = vector.extract_strided_slice %282 {offsets = [0, 96], sizes = [2, 32], strides = [1, 1]} : vector<2x128xf32> to vector<2x32xf32>
    %298 = arith.negf %297 : vector<2x32xf32>
    %299 = math.exp %298 : vector<2x32xf32>
    %cst_92 = arith.constant 1.000000e+00 : f32
    %300 = vector.broadcast %cst_92 : f32 to vector<2x32xf32>
    %301 = arith.addf %300, %299 : vector<2x32xf32>
    %302 = arith.divf %300, %301 : vector<2x32xf32>
    %303 = arith.mulf %294, %277 : vector<2x32xf32>
    %304 = arith.mulf %288, %296 : vector<2x32xf32>
    %305 = arith.addf %303, %304 : vector<2x32xf32>
    %306 = math.tanh %305 : vector<2x32xf32>
    %307 = arith.mulf %302, %306 : vector<2x32xf32>
    %c4_93 = arith.constant 4 : index
    %c0_94 = arith.constant 0 : index
    %308 = vector.load %arg10[%c4_93, %c0_94] : memref<16x128xf32, #tpu.memory_space<vmem>>, vector<2x128xf32>
    %cst_95 = arith.constant dense<0.000000e+00> : vector<2x128xf32>
    %309 = tpu.matmul %307, %243, %cst_95 {dimension_numbers = #tpu.dot_dimension_numbers<[1], [0], [0], [1], [0, 0, 1, 1], [], []>} : vector<2x32xf32>, vector<32x128xf32>, vector<2x128xf32> -> vector<2x128xf32>
    %310 = arith.addf %308, %309 : vector<2x128xf32>
    %311 = vector.extract_strided_slice %310 {offsets = [0, 0], sizes = [2, 32], strides = [1, 1]} : vector<2x128xf32> to vector<2x32xf32>
    %312 = arith.negf %311 : vector<2x32xf32>
    %313 = math.exp %312 : vector<2x32xf32>
    %cst_96 = arith.constant 1.000000e+00 : f32
    %314 = vector.broadcast %cst_96 : f32 to vector<2x32xf32>
    %315 = arith.addf %314, %313 : vector<2x32xf32>
    %316 = arith.divf %314, %315 : vector<2x32xf32>
    %317 = vector.extract_strided_slice %310 {offsets = [0, 32], sizes = [2, 32], strides = [1, 1]} : vector<2x128xf32> to vector<2x32xf32>
    %318 = arith.negf %317 : vector<2x32xf32>
    %319 = math.exp %318 : vector<2x32xf32>
    %cst_97 = arith.constant 1.000000e+00 : f32
    %320 = vector.broadcast %cst_97 : f32 to vector<2x32xf32>
    %321 = arith.addf %320, %319 : vector<2x32xf32>
    %322 = arith.divf %320, %321 : vector<2x32xf32>
    %323 = vector.extract_strided_slice %310 {offsets = [0, 64], sizes = [2, 32], strides = [1, 1]} : vector<2x128xf32> to vector<2x32xf32>
    %324 = math.tanh %323 : vector<2x32xf32>
    %325 = vector.extract_strided_slice %310 {offsets = [0, 96], sizes = [2, 32], strides = [1, 1]} : vector<2x128xf32> to vector<2x32xf32>
    %326 = arith.negf %325 : vector<2x32xf32>
    %327 = math.exp %326 : vector<2x32xf32>
    %cst_98 = arith.constant 1.000000e+00 : f32
    %328 = vector.broadcast %cst_98 : f32 to vector<2x32xf32>
    %329 = arith.addf %328, %327 : vector<2x32xf32>
    %330 = arith.divf %328, %329 : vector<2x32xf32>
    %331 = arith.mulf %322, %305 : vector<2x32xf32>
    %332 = arith.mulf %316, %324 : vector<2x32xf32>
    %333 = arith.addf %331, %332 : vector<2x32xf32>
    %334 = math.tanh %333 : vector<2x32xf32>
    %335 = arith.mulf %330, %334 : vector<2x32xf32>
    %c6_99 = arith.constant 6 : index
    %c0_100 = arith.constant 0 : index
    %336 = vector.load %arg10[%c6_99, %c0_100] : memref<16x128xf32, #tpu.memory_space<vmem>>, vector<2x128xf32>
    %cst_101 = arith.constant dense<0.000000e+00> : vector<2x128xf32>
    %337 = tpu.matmul %335, %243, %cst_101 {dimension_numbers = #tpu.dot_dimension_numbers<[1], [0], [0], [1], [0, 0, 1, 1], [], []>} : vector<2x32xf32>, vector<32x128xf32>, vector<2x128xf32> -> vector<2x128xf32>
    %338 = arith.addf %336, %337 : vector<2x128xf32>
    %339 = vector.extract_strided_slice %338 {offsets = [0, 0], sizes = [2, 32], strides = [1, 1]} : vector<2x128xf32> to vector<2x32xf32>
    %340 = arith.negf %339 : vector<2x32xf32>
    %341 = math.exp %340 : vector<2x32xf32>
    %cst_102 = arith.constant 1.000000e+00 : f32
    %342 = vector.broadcast %cst_102 : f32 to vector<2x32xf32>
    %343 = arith.addf %342, %341 : vector<2x32xf32>
    %344 = arith.divf %342, %343 : vector<2x32xf32>
    %345 = vector.extract_strided_slice %338 {offsets = [0, 32], sizes = [2, 32], strides = [1, 1]} : vector<2x128xf32> to vector<2x32xf32>
    %346 = arith.negf %345 : vector<2x32xf32>
    %347 = math.exp %346 : vector<2x32xf32>
    %cst_103 = arith.constant 1.000000e+00 : f32
    %348 = vector.broadcast %cst_103 : f32 to vector<2x32xf32>
    %349 = arith.addf %348, %347 : vector<2x32xf32>
    %350 = arith.divf %348, %349 : vector<2x32xf32>
    %351 = vector.extract_strided_slice %338 {offsets = [0, 64], sizes = [2, 32], strides = [1, 1]} : vector<2x128xf32> to vector<2x32xf32>
    %352 = math.tanh %351 : vector<2x32xf32>
    %353 = vector.extract_strided_slice %338 {offsets = [0, 96], sizes = [2, 32], strides = [1, 1]} : vector<2x128xf32> to vector<2x32xf32>
    %354 = arith.negf %353 : vector<2x32xf32>
    %355 = math.exp %354 : vector<2x32xf32>
    %cst_104 = arith.constant 1.000000e+00 : f32
    %356 = vector.broadcast %cst_104 : f32 to vector<2x32xf32>
    %357 = arith.addf %356, %355 : vector<2x32xf32>
    %358 = arith.divf %356, %357 : vector<2x32xf32>
    %359 = arith.mulf %350, %333 : vector<2x32xf32>
    %360 = arith.mulf %344, %352 : vector<2x32xf32>
    %361 = arith.addf %359, %360 : vector<2x32xf32>
    %362 = math.tanh %361 : vector<2x32xf32>
    %363 = arith.mulf %358, %362 : vector<2x32xf32>
    %c8_105 = arith.constant 8 : index
    %c0_106 = arith.constant 0 : index
    %364 = vector.load %arg10[%c8_105, %c0_106] : memref<16x128xf32, #tpu.memory_space<vmem>>, vector<2x128xf32>
    %cst_107 = arith.constant dense<0.000000e+00> : vector<2x128xf32>
    %365 = tpu.matmul %363, %243, %cst_107 {dimension_numbers = #tpu.dot_dimension_numbers<[1], [0], [0], [1], [0, 0, 1, 1], [], []>} : vector<2x32xf32>, vector<32x128xf32>, vector<2x128xf32> -> vector<2x128xf32>
    %366 = arith.addf %364, %365 : vector<2x128xf32>
    %367 = vector.extract_strided_slice %366 {offsets = [0, 0], sizes = [2, 32], strides = [1, 1]} : vector<2x128xf32> to vector<2x32xf32>
    %368 = arith.negf %367 : vector<2x32xf32>
    %369 = math.exp %368 : vector<2x32xf32>
    %cst_108 = arith.constant 1.000000e+00 : f32
    %370 = vector.broadcast %cst_108 : f32 to vector<2x32xf32>
    %371 = arith.addf %370, %369 : vector<2x32xf32>
    %372 = arith.divf %370, %371 : vector<2x32xf32>
    %373 = vector.extract_strided_slice %366 {offsets = [0, 32], sizes = [2, 32], strides = [1, 1]} : vector<2x128xf32> to vector<2x32xf32>
    %374 = arith.negf %373 : vector<2x32xf32>
    %375 = math.exp %374 : vector<2x32xf32>
    %cst_109 = arith.constant 1.000000e+00 : f32
    %376 = vector.broadcast %cst_109 : f32 to vector<2x32xf32>
    %377 = arith.addf %376, %375 : vector<2x32xf32>
    %378 = arith.divf %376, %377 : vector<2x32xf32>
    %379 = vector.extract_strided_slice %366 {offsets = [0, 64], sizes = [2, 32], strides = [1, 1]} : vector<2x128xf32> to vector<2x32xf32>
    %380 = math.tanh %379 : vector<2x32xf32>
    %381 = vector.extract_strided_slice %366 {offsets = [0, 96], sizes = [2, 32], strides = [1, 1]} : vector<2x128xf32> to vector<2x32xf32>
    %382 = arith.negf %381 : vector<2x32xf32>
    %383 = math.exp %382 : vector<2x32xf32>
    %cst_110 = arith.constant 1.000000e+00 : f32
    %384 = vector.broadcast %cst_110 : f32 to vector<2x32xf32>
    %385 = arith.addf %384, %383 : vector<2x32xf32>
    %386 = arith.divf %384, %385 : vector<2x32xf32>
    %387 = arith.mulf %378, %361 : vector<2x32xf32>
    %388 = arith.mulf %372, %380 : vector<2x32xf32>
    %389 = arith.addf %387, %388 : vector<2x32xf32>
    %390 = math.tanh %389 : vector<2x32xf32>
    %391 = arith.mulf %386, %390 : vector<2x32xf32>
    %c10_111 = arith.constant 10 : index
    %c0_112 = arith.constant 0 : index
    %392 = vector.load %arg10[%c10_111, %c0_112] : memref<16x128xf32, #tpu.memory_space<vmem>>, vector<2x128xf32>
    %cst_113 = arith.constant dense<0.000000e+00> : vector<2x128xf32>
    %393 = tpu.matmul %391, %243, %cst_113 {dimension_numbers = #tpu.dot_dimension_numbers<[1], [0], [0], [1], [0, 0, 1, 1], [], []>} : vector<2x32xf32>, vector<32x128xf32>, vector<2x128xf32> -> vector<2x128xf32>
    %394 = arith.addf %392, %393 : vector<2x128xf32>
    %395 = vector.extract_strided_slice %394 {offsets = [0, 0], sizes = [2, 32], strides = [1, 1]} : vector<2x128xf32> to vector<2x32xf32>
    %396 = arith.negf %395 : vector<2x32xf32>
    %397 = math.exp %396 : vector<2x32xf32>
    %cst_114 = arith.constant 1.000000e+00 : f32
    %398 = vector.broadcast %cst_114 : f32 to vector<2x32xf32>
    %399 = arith.addf %398, %397 : vector<2x32xf32>
    %400 = arith.divf %398, %399 : vector<2x32xf32>
    %401 = vector.extract_strided_slice %394 {offsets = [0, 32], sizes = [2, 32], strides = [1, 1]} : vector<2x128xf32> to vector<2x32xf32>
    %402 = arith.negf %401 : vector<2x32xf32>
    %403 = math.exp %402 : vector<2x32xf32>
    %cst_115 = arith.constant 1.000000e+00 : f32
    %404 = vector.broadcast %cst_115 : f32 to vector<2x32xf32>
    %405 = arith.addf %404, %403 : vector<2x32xf32>
    %406 = arith.divf %404, %405 : vector<2x32xf32>
    %407 = vector.extract_strided_slice %394 {offsets = [0, 64], sizes = [2, 32], strides = [1, 1]} : vector<2x128xf32> to vector<2x32xf32>
    %408 = math.tanh %407 : vector<2x32xf32>
    %409 = vector.extract_strided_slice %394 {offsets = [0, 96], sizes = [2, 32], strides = [1, 1]} : vector<2x128xf32> to vector<2x32xf32>
    %410 = arith.negf %409 : vector<2x32xf32>
    %411 = math.exp %410 : vector<2x32xf32>
    %cst_116 = arith.constant 1.000000e+00 : f32
    %412 = vector.broadcast %cst_116 : f32 to vector<2x32xf32>
    %413 = arith.addf %412, %411 : vector<2x32xf32>
    %414 = arith.divf %412, %413 : vector<2x32xf32>
    %415 = arith.mulf %406, %389 : vector<2x32xf32>
    %416 = arith.mulf %400, %408 : vector<2x32xf32>
    %417 = arith.addf %415, %416 : vector<2x32xf32>
    %418 = math.tanh %417 : vector<2x32xf32>
    %419 = arith.mulf %414, %418 : vector<2x32xf32>
    %c12_117 = arith.constant 12 : index
    %c0_118 = arith.constant 0 : index
    %420 = vector.load %arg10[%c12_117, %c0_118] : memref<16x128xf32, #tpu.memory_space<vmem>>, vector<2x128xf32>
    %cst_119 = arith.constant dense<0.000000e+00> : vector<2x128xf32>
    %421 = tpu.matmul %419, %243, %cst_119 {dimension_numbers = #tpu.dot_dimension_numbers<[1], [0], [0], [1], [0, 0, 1, 1], [], []>} : vector<2x32xf32>, vector<32x128xf32>, vector<2x128xf32> -> vector<2x128xf32>
    %422 = arith.addf %420, %421 : vector<2x128xf32>
    %423 = vector.extract_strided_slice %422 {offsets = [0, 0], sizes = [2, 32], strides = [1, 1]} : vector<2x128xf32> to vector<2x32xf32>
    %424 = arith.negf %423 : vector<2x32xf32>
    %425 = math.exp %424 : vector<2x32xf32>
    %cst_120 = arith.constant 1.000000e+00 : f32
    %426 = vector.broadcast %cst_120 : f32 to vector<2x32xf32>
    %427 = arith.addf %426, %425 : vector<2x32xf32>
    %428 = arith.divf %426, %427 : vector<2x32xf32>
    %429 = vector.extract_strided_slice %422 {offsets = [0, 32], sizes = [2, 32], strides = [1, 1]} : vector<2x128xf32> to vector<2x32xf32>
    %430 = arith.negf %429 : vector<2x32xf32>
    %431 = math.exp %430 : vector<2x32xf32>
    %cst_121 = arith.constant 1.000000e+00 : f32
    %432 = vector.broadcast %cst_121 : f32 to vector<2x32xf32>
    %433 = arith.addf %432, %431 : vector<2x32xf32>
    %434 = arith.divf %432, %433 : vector<2x32xf32>
    %435 = vector.extract_strided_slice %422 {offsets = [0, 64], sizes = [2, 32], strides = [1, 1]} : vector<2x128xf32> to vector<2x32xf32>
    %436 = math.tanh %435 : vector<2x32xf32>
    %437 = vector.extract_strided_slice %422 {offsets = [0, 96], sizes = [2, 32], strides = [1, 1]} : vector<2x128xf32> to vector<2x32xf32>
    %438 = arith.negf %437 : vector<2x32xf32>
    %439 = math.exp %438 : vector<2x32xf32>
    %cst_122 = arith.constant 1.000000e+00 : f32
    %440 = vector.broadcast %cst_122 : f32 to vector<2x32xf32>
    %441 = arith.addf %440, %439 : vector<2x32xf32>
    %442 = arith.divf %440, %441 : vector<2x32xf32>
    %443 = arith.mulf %434, %417 : vector<2x32xf32>
    %444 = arith.mulf %428, %436 : vector<2x32xf32>
    %445 = arith.addf %443, %444 : vector<2x32xf32>
    %446 = math.tanh %445 : vector<2x32xf32>
    %447 = arith.mulf %442, %446 : vector<2x32xf32>
    %c14_123 = arith.constant 14 : index
    %c0_124 = arith.constant 0 : index
    %448 = vector.load %arg10[%c14_123, %c0_124] : memref<16x128xf32, #tpu.memory_space<vmem>>, vector<2x128xf32>
    %cst_125 = arith.constant dense<0.000000e+00> : vector<2x128xf32>
    %449 = tpu.matmul %447, %243, %cst_125 {dimension_numbers = #tpu.dot_dimension_numbers<[1], [0], [0], [1], [0, 0, 1, 1], [], []>} : vector<2x32xf32>, vector<32x128xf32>, vector<2x128xf32> -> vector<2x128xf32>
    %450 = arith.addf %448, %449 : vector<2x128xf32>
    %451 = vector.extract_strided_slice %450 {offsets = [0, 0], sizes = [2, 32], strides = [1, 1]} : vector<2x128xf32> to vector<2x32xf32>
    %452 = arith.negf %451 : vector<2x32xf32>
    %453 = math.exp %452 : vector<2x32xf32>
    %cst_126 = arith.constant 1.000000e+00 : f32
    %454 = vector.broadcast %cst_126 : f32 to vector<2x32xf32>
    %455 = arith.addf %454, %453 : vector<2x32xf32>
    %456 = arith.divf %454, %455 : vector<2x32xf32>
    %457 = vector.extract_strided_slice %450 {offsets = [0, 32], sizes = [2, 32], strides = [1, 1]} : vector<2x128xf32> to vector<2x32xf32>
    %458 = arith.negf %457 : vector<2x32xf32>
    %459 = math.exp %458 : vector<2x32xf32>
    %cst_127 = arith.constant 1.000000e+00 : f32
    %460 = vector.broadcast %cst_127 : f32 to vector<2x32xf32>
    %461 = arith.addf %460, %459 : vector<2x32xf32>
    %462 = arith.divf %460, %461 : vector<2x32xf32>
    %463 = vector.extract_strided_slice %450 {offsets = [0, 64], sizes = [2, 32], strides = [1, 1]} : vector<2x128xf32> to vector<2x32xf32>
    %464 = math.tanh %463 : vector<2x32xf32>
    %465 = vector.extract_strided_slice %450 {offsets = [0, 96], sizes = [2, 32], strides = [1, 1]} : vector<2x128xf32> to vector<2x32xf32>
    %466 = arith.negf %465 : vector<2x32xf32>
    %467 = math.exp %466 : vector<2x32xf32>
    %cst_128 = arith.constant 1.000000e+00 : f32
    %468 = vector.broadcast %cst_128 : f32 to vector<2x32xf32>
    %469 = arith.addf %468, %467 : vector<2x32xf32>
    %470 = arith.divf %468, %469 : vector<2x32xf32>
    %471 = arith.mulf %462, %445 : vector<2x32xf32>
    %472 = arith.mulf %456, %464 : vector<2x32xf32>
    %473 = arith.addf %471, %472 : vector<2x32xf32>
    %474 = math.tanh %473 : vector<2x32xf32>
    %475 = arith.mulf %470, %474 : vector<2x32xf32>
    %c0_129 = arith.constant 0 : index
    %c0_130 = arith.constant 0 : index
    %476 = vector.load %arg7[%c0_129, %c0_130] : memref<32x128xf32, #tpu.memory_space<vmem>>, vector<32x128xf32>
    %cst_131 = arith.constant dense<0.000000e+00> : vector<2x128xf32>
    %477 = tpu.matmul %475, %476, %cst_131 {dimension_numbers = #tpu.dot_dimension_numbers<[1], [0], [0], [1], [0, 0, 1, 1], [], []>} : vector<2x32xf32>, vector<32x128xf32>, vector<2x128xf32> -> vector<2x128xf32>
    %c0_132 = arith.constant 0 : index
    %c0_133 = arith.constant 0 : index
    %478 = vector.load %arg8[%c0_132, %c0_133] : memref<1x128xf32, #tpu.memory_space<vmem>>, vector<1x128xf32>
    %479 = vector.broadcast %478 : vector<1x128xf32> to vector<2x128xf32>
    %480 = arith.addf %477, %479 : vector<2x128xf32>
    %c0_134 = arith.constant 0 : index
    %c0_135 = arith.constant 0 : index
    %481 = vector.load %arg9[%c0_134, %c0_135] : memref<2x128xf32, #tpu.memory_space<vmem>>, vector<2x128xf32>
    tpu.vector_store %arg9[%c0_134, %c0_135], %480 {strides = array<i32>} : memref<2x128xf32, #tpu.memory_space<vmem>>, vector<2x128xf32>,
    return
  }
}

</mosaic_0001>

<bundles_post_ra>
// kernel: lstm_model_forward.1
= control target key start
LH: loop header
LB: loop body
LE: loop exit
PB: predicated region body
PF: predicated region fallthrough
CT: control target
= control target key end

     0   :  { %14 = vsyncpa [#allocation5], 0  ;;  %s2996_s0 = inlined_call_operand.vmem [shape: f32[16,4], index: 0, kind: input, shape index: {}]   ;;  %s2997_s1 = inlined_call_operand.vmem [shape: f32[4,128], index: 1, kind: input, shape index: {}]   ;;  %s2998_s2 = inlined_call_operand.vmem [shape: f32[32,128], index: 2, kind: input, shape index: {}]   ;;  %s2999_s3 = inlined_call_operand.vmem [shape: f32[1,128], index: 3, kind: input, shape index: {}]   ;;  %s3000_s4 = inlined_call_operand.hbm [shape: f32[32,128], index: 4, kind: input, shape index: {}]   ;;  %s3001_s5 = inlined_call_operand.hbm [shape: f32[32,128], index: 5, kind: input, shape index: {}]   ;;  %s3002_s6 = inlined_call_operand.vmem [shape: f32[1,128], index: 6, kind: input, shape index: {}]   ;;  %s3003_s7 = inlined_call_operand.hbm [shape: f32[32,128], index: 7, kind: input, shape index: {}]   ;;  %s3004_s8 = inlined_call_operand.vmem [shape: f32[1,128], index: 8, kind: input, shape index: {}]   ;;  %s3005_s9 = inlined_call_operand.vmem [shape: f32[2,128], index: 9, kind: output, shape index: {}]  }
   0x1   :  { %15 = vsyncpa [#allocation7], 0  ;;  %s2652_s30 = smov [#allocation6]   ;;  %s2653_s11 = smov [#allocation4]  }
   0x2   :  { %s41_s10 = sshll.u32 %s2652_s30, 4  ;;  %s29_s12 = sshll.u32 %s2653_s11, 4  ;;  %s42_s10 = int_to_ptr.vmem [resolvable:$true] %s41_s10  ;;  %s2712_s12 = int_to_ptr.vmem [resolvable:$true] %s29_s12 }
   0x3   :  { %s2582_s15 = scalar_lea.hbm %s3001_s5, 512 }
   0x4   :  { %p2583_p0 = scmp.ne.s32.totalorder %s3001_s5, %s2582_s15  ;;  %p2586_p1 = scmp.lt.u32.totalorder %s2582_s15, %s3001_s5 }
   0x6   :  { %p2588_p2 = pnand %p2586_p1, %p2583_p0 }
   0x8   :  { %2591 = shalt.err (!%p2588_p2)
}
   0x9   :  { %s2592_s20 = scalar_lea.vmem %s42_s10, 512  ;;  %p2597_p4 = scmp.lt.s32.totalorder %s42_s10, %s42_s10 }
   0xa   :  { %p2593_p3 = scmp.ne.s32.totalorder %s42_s10, %s2592_s20  ;;  %p2598_p5 = scmp.lt.s32.totalorder %s2592_s20, %s2592_s20 }
   0xc   :  { %p2599_p6 = por %p2598_p5, %p2597_p4 }
   0xe   :  { %p2600_p7 = pnand %p2599_p6, %p2593_p3 }
  0x10   :  { %2603 = shalt.err (!%p2600_p7)
}
  0x11   :  { %s2654_s21 = smov 128   ;;  %s2655_s22 = smov 8  }
  0x12   :  { %47 = dma.hbm_to_vmem [thread:$0]  %s3001_s5, 512, %s42_s10, [#allocation7], %s2654_s21, %s2654_s21, %s2655_s22  }
  0x13   :  { %s2604_s27 = scalar_lea.hbm %s3000_s4, 512 }
  0x14   :  { %p2605_p8 = scmp.ne.s32.totalorder %s3000_s4, %s2604_s27  ;;  %p2608_p9 = scmp.lt.u32.totalorder %s2604_s27, %s3000_s4 }
  0x16   :  { %p2610_p10 = pnand %p2608_p9, %p2605_p8 }
  0x18   :  { %2613 = shalt.err (!%p2610_p10)
}
  0x19   :  { %s2614_s13 = scalar_lea.vmem %s2712_s12, 512  ;;  %p2619_p12 = scmp.lt.s32.totalorder %s2712_s12, %s2712_s12 }
  0x1a   :  { %p2615_p11 = scmp.ne.s32.totalorder %s2712_s12, %s2614_s13  ;;  %p2620_p13 = scmp.lt.s32.totalorder %s2614_s13, %s2614_s13 }
  0x1c   :  { %p2621_p0 = por %p2620_p13, %p2619_p12 }
  0x1e   :  { %p2622_p1 = pnand %p2621_p0, %p2615_p11 }
  0x20   :  { %2625 = shalt.err (!%p2622_p1)
}
  0x21   :  { %35 = dma.hbm_to_vmem [thread:$0]  %s3000_s4, 512, %s2712_s12, [#allocation5], %s2654_s21, %s2654_s21, %s2655_s22  }
  0x22   :  { %s2656_s14 = smov [#allocation8]   ;;  %s2626_s18 = scalar_lea.hbm %s3003_s7, 512 }
  0x23   :  { %s55_s15 = sshll.u32 %s2656_s14, 4  ;;  %p2627_p2 = scmp.ne.s32.totalorder %s3003_s7, %s2626_s18  ;;  %s56_s15 = int_to_ptr.vmem [resolvable:$true] %s55_s15 }
  0x24   :  { %p2630_p3 = scmp.lt.u32.totalorder %s2626_s18, %s3003_s7 }
  0x26   :  { %p2632_p4 = pnand %p2630_p3, %p2627_p2 }
  0x28   :  { %2635 = shalt.err (!%p2632_p4)
}
  0x29   :  { %s2636_s25 = scalar_lea.vmem %s56_s15, 512  ;;  %p2641_p6 = scmp.lt.s32.totalorder %s56_s15, %s56_s15 }
  0x2a   :  { %p2637_p5 = scmp.ne.s32.totalorder %s56_s15, %s2636_s25  ;;  %p2642_p7 = scmp.lt.s32.totalorder %s2636_s25, %s2636_s25 }
  0x2c   :  { %p2643_p8 = por %p2642_p7, %p2641_p6 }
  0x2e   :  { %p2644_p9 = pnand %p2643_p8, %p2637_p5 }
  0x30   :  { %2647 = shalt.err (!%p2644_p9)
}
  0x31   :  { %61 = dma.hbm_to_vmem [thread:$0]  %s3003_s7, 512, %s56_s15, [#allocation7], %s2654_s21, %s2654_s21, %s2655_s22  }
  0x32   :  { %2648 = dma.done.wait [#allocation5], 512  }
  0x33   :  { %2649 = vsyncadd [#allocation5], 4294966784 }
  0x34   :  { %2650 = dma.done.wait [#allocation7], 1024  }
  0x35   :  { %2651 = vsyncadd [#allocation7], 4294966272  ;;  %v2657_v0 = vmov 0.0|0.0   ;;  %vm2658_vm0 = vmmov 0   ;;  %v2659_v1 = vmov 0.0   ;;  %vm94_vm1 = vcmask 1043456  }
  0x36   :  { %2334 = vmatprep.subr.bf16.mxu1 %v2657_v0  ;;  %2144 = vmatprep.mubr.msk.f32.mxu1 %vm2658_vm0, %v2659_v1  ;;  %vm87_vm2 = vcmask 31744   ;;  %v73_v2 = vld [vmem:[%s2997_s1] sm:$0xf]  ;;  %v80_v4 = vld [vmem:[%s2996_s0 + $0x8] sm:$0xff]  ;;  %v76_v7 = vld [vmem:[%s2998_s2 + $0x10] sm:$0xff]  ;;  %s2660_s15 = smov 64  }
  0x37   :  { %v79_v3 = vld [vmem:[%s2996_s0] sm:$0xff]  ;;  %2131 = vmatprep.subr.msk.mxu0 %vm94_vm1, %v73_v2  ;;  %v75_v6 = vld [vmem:[%s2998_s2 + $0x8] sm:$0xff]  ;;  %v77_v9 = vld [vmem:[%s2998_s2 + $0x18] sm:$0xff]  ;;  %vm279_vm3 = vcmask 254976   ;;  %vm176_vm4 = vcmask 261120  }
  0x38   :  { %2133 = vmatprep.mubr.msk.f32.mxu0 %vm87_vm2, %v79_v3  ;;  %v74_v5 = vld [vmem:[%s2998_s2] sm:$0xff]  ;;  %2132 = vmatpush3.msk.msra.mxu0 %vm94_vm1, %v73_v2  ;;  %v2792_v10 = vpack.c.bf16 %v77_v9, %v76_v7 }
  0x39   :  { %v2785_v8 = vpack.c.bf16 %v75_v6, %v74_v5  ;;  %2134 = vmatmul.mubr.msk.f32.vlgmr.msra.gmra.mrb[0].mxu0 %vm87_vm2, %v80_v4  ;;  %2340 = vmatprep.subr.bf16.mxu0 %v2657_v0  ;;  %v1998_v11 = vld [vmem:[%s2999_s3] ss:$0 sm:$0xff]  ;;  %s2661_s3 = smov 32  }
  0x3a   :  { %2155 = vmatprep.mubr.msk.f32.mxu0 %vm2658_vm0, %v2659_v1 }
  0x3b   :  { %2336 = vmatpush3.bf16.msra.mxu1 %v2785_v8  ;;  %2342 = vmatpush3.bf16.msra.mxu0 %v2785_v8 }
  0x3c   :  { %2337 = vmatprep.subr.bf16.mxu1 %v2657_v0  ;;  %2343 = vmatprep.subr.bf16.mxu0 %v2657_v0 }
  0x3f   :  { %2339 = vmatpush3.bf16.msra.mxu1 %v2792_v10  ;;  %2345 = vmatpush3.bf16.msra.mxu0 %v2792_v10 }
  0x40   :  { %2346 = vmatprep.subr.bf16.mxu1 %v2657_v0  ;;  %2352 = vmatprep.subr.bf16.mxu0 %v2657_v0 }
  0x42   :  { %2145 = vmatmul.mubr.f32.vlgmr.msra.gmra.mrb[0].mxu1 %v2659_v1 }
  0x43   :  { %2348 = vmatpush3.bf16.msra.mxu1 %v2785_v8  ;;  %2166 = vmatprep.mubr.msk.f32.mxu1 %vm2658_vm0, %v2659_v1 }
  0x44   :  { %2349 = vmatprep.subr.bf16.mxu1 %v2657_v0 }
  0x47   :  { %2351 = vmatpush3.bf16.msra.mxu1 %v2792_v10 }
  0x48   :  { %2358 = vmatprep.subr.bf16.mxu1 %v2657_v0 }
 0x10c   :  { %v2135_v12 = vpop.f32.mrb[0].mxu0 }
 0x10d   :  { %v170_v13 = vadd.f32 %v2135_v12, %v1998_v11  ;;  %v164_v14 = vpop.f32.mrb[1].mxu0 }
 0x10e   :  { %v165_v15 = vadd.f32 %v1998_v11, %v164_v14 }
 0x10f   :  { %174 = vst [vmem:[#allocation2 + $0x8] sm:$0xff] %v170_v13 }
 0x110   :  { %173 = vst [vmem:[#allocation2] sm:$0xff] %v165_v15 }
 0x115   :  { %v246_v16 = vpop.f32.mrb[0].mxu1 }
 0x116   :  { %v2146_v17 = vpop.f32.mrb[1].mxu1 }
 0x117   :  { %v175_v18 = vld [vmem:[#allocation2] sm:$0x3]  ;;  %v281_v34 = vld [vmem:[#allocation2 + $0x2] sm:$0x3]  ;;  %v384_v52 = vld [vmem:[#allocation2 + $0x4] sm:$0x3] }
 0x118   :  { %v250_v19 = vadd.f32 %v246_v16, %v175_v18  ;;  %v487_v9 = vld [vmem:[#allocation2 + $0x6] sm:$0x3] }
 0x11a   :  { %2454 = vtanh.f32 %v250_v19  ;;  %v2002_v21 = vmul.f32 -1.442695, %v250_v19 }
 0x11c   :  { %2456 = vpow2.f32 %v2002_v21 }
 0x124   :  { %v2455_v20 = vpop.eup %2454 }
 0x125   :  { %260 = vrot.lane.b32.xlu0 %v2455_v20, %s2660_s15 }
 0x126   :  { %v2457_v22 = vpop.eup %2456 }
 0x127   :  { %v254_v23 = vadd.f32 1.0, %v2457_v22 }
 0x129   :  { %2458 = vrcp.f32 %v254_v23 }
 0x133   :  { %v2459_v24 = vpop.eup %2458 }
 0x134   :  { %v258_v27 = vmul.f32 0.0, %v2459_v24 }
 0x197   :  { %v261_v25 = vpop.permute.xlu0 %260 }
 0x198   :  { %v263_v26 = vmul.f32 %v2459_v24, %v261_v25 }
 0x19a   :  { %265 = vrot.lane.b32.xlu0 %v263_v26, %s2661_s3 }
 0x20c   :  { %v266_v28 = vpop.permute.xlu0 %265 }
 0x20d   :  { %v268_v29 = vadd.f32 %v266_v28, %v258_v27  ;;  %v590_v28 = vld [vmem:[#allocation2 + $0x8] sm:$0x3] }
 0x20f   :  { %2460 = vtanh.f32 %v268_v29 }
 0x219   :  { %v2461_v30 = vpop.eup %2460 }
 0x21a   :  { %271 = vrot.lane.b32.xlu1 %v2461_v30, %s2660_s15 }
 0x28c   :  { %v272_v31 = vpop.permute.xlu1 %271 }
 0x28d   :  { %v274_v32 = vmul.f32 %v2459_v24, %v272_v31 }
 0x28f   :  { %276 = vrot.lane.b32.xlu1 %v274_v32, %s2661_s3 }
 0x301   :  { %v277_v33 = vpop.permute.xlu1 %276 }
 0x302   :  { %280 = vst.msk [vmem:[#allocation3] sm:$0x3] %vm279_vm3, %v277_v33  ;;  %2156 = vmatmul.mubr.msk.f32.vlgmr.msra.gmra.mrb[2].mxu0 %vm176_vm4, %v277_v33 }
 0x303   :  { %2354 = vmatpush3.bf16.msra.mxu0 %v2785_v8  ;;  %2177 = vmatprep.mubr.msk.f32.mxu0 %vm2658_vm0, %v2659_v1 }
 0x304   :  { %2355 = vmatprep.subr.bf16.mxu0 %v2657_v0 }
 0x307   :  { %2357 = vmatpush3.bf16.msra.mxu0 %v2792_v10 }
 0x308   :  { %2364 = vmatprep.subr.bf16.mxu0 %v2657_v0 }
 0x3d5   :  { %v350_v35 = vpop.f32.mrb[2].mxu0 }
 0x3d6   :  { %v354_v36 = vadd.f32 %v350_v35, %v281_v34  ;;  %v2157_v37 = vpop.f32.mrb[3].mxu0 }
 0x3d8   :  { %2462 = vtanh.f32 %v354_v36  ;;  %v2004_v39 = vmul.f32 -1.442695, %v354_v36 }
 0x3da   :  { %2464 = vpow2.f32 %v2004_v39 }
 0x3e2   :  { %v2463_v38 = vpop.eup %2462 }
 0x3e3   :  { %364 = vrot.lane.b32.xlu0 %v2463_v38, %s2660_s15 }
 0x3e4   :  { %v2465_v40 = vpop.eup %2464 }
 0x3e5   :  { %v358_v41 = vadd.f32 1.0, %v2465_v40 }
 0x3e7   :  { %2466 = vrcp.f32 %v358_v41 }
 0x3f1   :  { %v2467_v42 = vpop.eup %2466 }
 0x3f2   :  { %v362_v45 = vmul.f32 %v2467_v42, %v268_v29 }
 0x455   :  { %v365_v43 = vpop.permute.xlu0 %364 }
 0x456   :  { %v367_v44 = vmul.f32 %v2467_v42, %v365_v43 }
 0x458   :  { %369 = vrot.lane.b32.xlu1 %v367_v44, %s2661_s3 }
 0x4ca   :  { %v370_v46 = vpop.permute.xlu1 %369 }
 0x4cb   :  { %v372_v47 = vadd.f32 %v370_v46, %v362_v45  ;;  %v693_v46 = vld [vmem:[#allocation2 + $0xa] sm:$0x3] }
 0x4cd   :  { %2468 = vtanh.f32 %v372_v47 }
 0x4d7   :  { %v2469_v48 = vpop.eup %2468 }
 0x4d8   :  { %375 = vrot.lane.b32.xlu0 %v2469_v48, %s2660_s15 }
 0x54a   :  { %v376_v49 = vpop.permute.xlu0 %375 }
 0x54b   :  { %v378_v50 = vmul.f32 %v2467_v42, %v376_v49 }
 0x54d   :  { %380 = vrot.lane.b32.xlu1 %v378_v50, %s2661_s3 }
 0x5bf   :  { %v381_v51 = vpop.permute.xlu1 %380 }
 0x5c0   :  { %383 = vst.msk [vmem:[#allocation3 + $0x2] sm:$0x3] %vm279_vm3, %v381_v51  ;;  %2167 = vmatmul.mubr.msk.f32.vlgmr.msra.gmra.mrb[2].mxu1 %vm176_vm4, %v381_v51 }
 0x5c1   :  { %2360 = vmatpush3.bf16.msra.mxu1 %v2785_v8  ;;  %2188 = vmatprep.mubr.msk.f32.mxu1 %vm2658_vm0, %v2659_v1 }
 0x5c2   :  { %2361 = vmatprep.subr.bf16.mxu1 %v2657_v0 }
 0x5c5   :  { %2363 = vmatpush3.bf16.msra.mxu1 %v2792_v10 }
 0x5c6   :  { %2370 = vmatprep.subr.bf16.mxu1 %v2657_v0 }
 0x693   :  { %v453_v53 = vpop.f32.mrb[2].mxu1 }
 0x694   :  { %v457_v54 = vadd.f32 %v453_v53, %v384_v52  ;;  %v2168_v55 = vpop.f32.mrb[3].mxu1 }
 0x696   :  { %2470 = vtanh.f32 %v457_v54  ;;  %v2006_v57 = vmul.f32 -1.442695, %v457_v54 }
 0x698   :  { %2472 = vpow2.f32 %v2006_v57 }
 0x6a0   :  { %v2471_v56 = vpop.eup %2470 }
 0x6a1   :  { %467 = vrot.lane.b32.xlu0 %v2471_v56, %s2660_s15 }
 0x6a2   :  { %v2473_v58 = vpop.eup %2472 }
 0x6a3   :  { %v461_v59 = vadd.f32 1.0, %v2473_v58 }
 0x6a5   :  { %2474 = vrcp.f32 %v461_v59 }
 0x6af   :  { %v2475_v60 = vpop.eup %2474 }
 0x6b0   :  { %v465_v63 = vmul.f32 %v2475_v60, %v372_v47 }
 0x713   :  { %v468_v61 = vpop.permute.xlu0 %467 }
 0x714   :  { %v470_v62 = vmul.f32 %v2475_v60, %v468_v61 }
 0x716   :  { %472 = vrot.lane.b32.xlu1 %v470_v62, %s2661_s3 }
 0x788   :  { %v473_v2 = vpop.permute.xlu1 %472 }
 0x789   :  { %v475_v3 = vadd.f32 %v473_v2, %v465_v63  ;;  %v796_v63 = vld [vmem:[#allocation2 + $0xc] sm:$0x3] }
 0x78b   :  { %2476 = vtanh.f32 %v475_v3 }
 0x795   :  { %v2477_v4 = vpop.eup %2476 }
 0x796   :  { %478 = vrot.lane.b32.xlu0 %v2477_v4, %s2660_s15 }
 0x808   :  { %v479_v5 = vpop.permute.xlu0 %478 }
 0x809   :  { %v481_v6 = vmul.f32 %v2475_v60, %v479_v5 }
 0x80b   :  { %483 = vrot.lane.b32.xlu1 %v481_v6, %s2661_s3 }
 0x87d   :  { %v484_v7 = vpop.permute.xlu1 %483 }
 0x87e   :  { %486 = vst.msk [vmem:[#allocation3 + $0x4] sm:$0x3] %vm279_vm3, %v484_v7  ;;  %2178 = vmatmul.mubr.msk.f32.vlgmr.msra.gmra.mrb[4].mxu0 %vm176_vm4, %v484_v7 }
 0x87f   :  { %2366 = vmatpush3.bf16.msra.mxu0 %v2785_v8  ;;  %2199 = vmatprep.mubr.msk.f32.mxu0 %vm2658_vm0, %v2659_v1 }
 0x880   :  { %2367 = vmatprep.subr.bf16.mxu0 %v2657_v0 }
 0x883   :  { %2369 = vmatpush3.bf16.msra.mxu0 %v2792_v10 }
 0x884   :  { %2376 = vmatprep.subr.bf16.mxu0 %v2657_v0 }
 0x951   :  { %v556_v11 = vpop.f32.mrb[4].mxu0 }
 0x952   :  { %v560_v12 = vadd.f32 %v556_v11, %v487_v9  ;;  %v2179_v13 = vpop.f32.mrb[5].mxu0 }
 0x954   :  { %2478 = vtanh.f32 %v560_v12  ;;  %v2008_v15 = vmul.f32 -1.442695, %v560_v12 }
 0x956   :  { %2480 = vpow2.f32 %v2008_v15 }
 0x95e   :  { %v2479_v14 = vpop.eup %2478 }
 0x95f   :  { %570 = vrot.lane.b32.xlu0 %v2479_v14, %s2660_s15 }
 0x960   :  { %v2481_v16 = vpop.eup %2480 }
 0x961   :  { %v564_v17 = vadd.f32 1.0, %v2481_v16 }
 0x963   :  { %2482 = vrcp.f32 %v564_v17 }
 0x96d   :  { %v2483_v18 = vpop.eup %2482 }
 0x96e   :  { %v568_v21 = vmul.f32 %v2483_v18, %v475_v3 }
 0x9d1   :  { %v571_v19 = vpop.permute.xlu0 %570 }
 0x9d2   :  { %v573_v20 = vmul.f32 %v2483_v18, %v571_v19 }
 0x9d4   :  { %575 = vrot.lane.b32.xlu1 %v573_v20, %s2661_s3 }
 0xa46   :  { %v576_v22 = vpop.permute.xlu1 %575 }
 0xa47   :  { %v578_v23 = vadd.f32 %v576_v22, %v568_v21  ;;  %v899_v21 = vld [vmem:[#allocation2 + $0xe] sm:$0x3] }
 0xa49   :  { %2484 = vtanh.f32 %v578_v23 }
 0xa53   :  { %v2485_v24 = vpop.eup %2484 }
 0xa54   :  { %581 = vrot.lane.b32.xlu0 %v2485_v24, %s2660_s15 }
 0xac6   :  { %v582_v25 = vpop.permute.xlu0 %581 }
 0xac7   :  { %v584_v26 = vmul.f32 %v2483_v18, %v582_v25 }
 0xac9   :  { %586 = vrot.lane.b32.xlu1 %v584_v26, %s2661_s3 }
 0xb3b   :  { %v587_v27 = vpop.permute.xlu1 %586 }
 0xb3c   :  { %589 = vst.msk [vmem:[#allocation3 + $0x6] sm:$0x3] %vm279_vm3, %v587_v27  ;;  %2189 = vmatmul.mubr.msk.f32.vlgmr.msra.gmra.mrb[4].mxu1 %vm176_vm4, %v587_v27 }
 0xb3d   :  { %2372 = vmatpush3.bf16.msra.mxu1 %v2785_v8  ;;  %2210 = vmatprep.mubr.msk.f32.mxu1 %vm2658_vm0, %v2659_v1 }
 0xb3e   :  { %2373 = vmatprep.subr.bf16.mxu1 %v2657_v0 }
 0xb41   :  { %2375 = vmatpush3.bf16.msra.mxu1 %v2792_v10 }
 0xb43   :  { %v1011_v62 = vld [vmem:[#allocation3] sm:$0xff] }
 0xc0f   :  { %v659_v29 = vpop.f32.mrb[4].mxu1 }
 0xc10   :  { %v663_v30 = vadd.f32 %v659_v29, %v590_v28  ;;  %v2190_v31 = vpop.f32.mrb[5].mxu1 }
 0xc12   :  { %2486 = vtanh.f32 %v663_v30  ;;  %v2010_v33 = vmul.f32 -1.442695, %v663_v30 }
 0xc14   :  { %2488 = vpow2.f32 %v2010_v33 }
 0xc1c   :  { %v2487_v32 = vpop.eup %2486 }
 0xc1d   :  { %673 = vrot.lane.b32.xlu0 %v2487_v32, %s2660_s15 }
 0xc1e   :  { %v2489_v34 = vpop.eup %2488 }
 0xc1f   :  { %v667_v35 = vadd.f32 1.0, %v2489_v34 }
 0xc21   :  { %2490 = vrcp.f32 %v667_v35 }
 0xc2b   :  { %v2491_v36 = vpop.eup %2490 }
 0xc2c   :  { %v671_v39 = vmul.f32 %v2491_v36, %v578_v23 }
 0xc8f   :  { %v674_v37 = vpop.permute.xlu0 %673 }
 0xc90   :  { %v676_v38 = vmul.f32 %v2491_v36, %v674_v37  ;;  %v1003_v37 = vld [vmem:[#allocation4 + $0x8] sm:$0xff] }
 0xc92   :  { %678 = vrot.lane.b32.xlu1 %v676_v38, %s2661_s3 }
 0xd04   :  { %v679_v40 = vpop.permute.xlu1 %678 }
 0xd05   :  { %v681_v41 = vadd.f32 %v679_v40, %v671_v39  ;;  %v1004_v39 = vld [vmem:[#allocation4 + $0x10] sm:$0xff]  ;;  %v1005_v40 = vld [vmem:[#allocation4 + $0x18] sm:$0xff] }
 0xd07   :  { %2492 = vtanh.f32 %v681_v41 }
 0xd11   :  { %v2493_v42 = vpop.eup %2492 }
 0xd12   :  { %684 = vrot.lane.b32.xlu0 %v2493_v42, %s2660_s15  ;;  %v1006_v42 = vld [vmem:[#allocation6] sm:$0xff] }
 0xd84   :  { %v685_v43 = vpop.permute.xlu0 %684 }
 0xd85   :  { %v687_v44 = vmul.f32 %v2491_v36, %v685_v43  ;;  %v1002_v36 = vld [vmem:[#allocation4] sm:$0xff]  ;;  %v1007_v43 = vld [vmem:[#allocation6 + $0x8] sm:$0xff] }
 0xd86   :  { %v2382_v38 = vpack.c.bf16 %v1003_v37, %v1002_v36 }
 0xd87   :  { %689 = vrot.lane.b32.xlu1 %v687_v44, %s2661_s3  ;;  %v1008_v44 = vld [vmem:[#allocation6 + $0x10] sm:$0xff] }
 0xd88   :  { %2383 = vmatprep.subr.bf16.mxu1 %v2382_v38 }
 0xdf9   :  { %v690_v45 = vpop.permute.xlu1 %689 }
 0xdfa   :  { %692 = vst.msk [vmem:[#allocation3 + $0x8] sm:$0x3] %vm279_vm3, %v690_v45  ;;  %2200 = vmatmul.mubr.msk.f32.vlgmr.msra.gmra.mrb[6].mxu0 %vm176_vm4, %v690_v45  ;;  %v2891_v45 = vpack.c.bf16 %v1007_v43, %v1006_v42 }
 0xdfb   :  { %2378 = vmatpush3.bf16.msra.mxu0 %v2785_v8  ;;  %2221 = vmatprep.mubr.msk.f32.mxu0 %vm2658_vm0, %v2659_v1 }
 0xdfc   :  { %2379 = vmatprep.subr.bf16.mxu0 %v2657_v0 }
 0xdff   :  { %2381 = vmatpush3.bf16.msra.mxu0 %v2792_v10 }
 0xe00   :  { %2390 = vmatprep.subr.bf16.mxu0 %v2657_v0 }
 0xecd   :  { %v762_v47 = vpop.f32.mrb[6].mxu0 }
 0xece   :  { %v766_v48 = vadd.f32 %v762_v47, %v693_v46  ;;  %v2201_v49 = vpop.f32.mrb[7].mxu0  ;;  %v1009_v46 = vld [vmem:[#allocation6 + $0x18] sm:$0xff] }
 0xecf   :  { %v2894_v49 = vpack.c.bf16 %v1009_v46, %v1008_v44 }
 0xed0   :  { %2494 = vtanh.f32 %v766_v48  ;;  %v2012_v51 = vmul.f32 -1.442695, %v766_v48 }
 0xed2   :  { %2496 = vpow2.f32 %v2012_v51 }
 0xeda   :  { %v2495_v50 = vpop.eup %2494 }
 0xedb   :  { %776 = vrot.lane.b32.xlu0 %v2495_v50, %s2660_s15 }
 0xedc   :  { %v2497_v8 = vpop.eup %2496 }
 0xedd   :  { %v770_v52 = vadd.f32 1.0, %v2497_v8 }
 0xedf   :  { %2498 = vrcp.f32 %v770_v52 }
 0xee9   :  { %v2499_v53 = vpop.eup %2498 }
 0xeea   :  { %v774_v10 = vmul.f32 %v2499_v53, %v681_v41  ;;  %v2386_v41 = vpack.c.bf16 %v1005_v40, %v1004_v39 }
 0xf4d   :  { %v777_v54 = vpop.permute.xlu0 %776 }
 0xf4e   :  { %v779_v55 = vmul.f32 %v2499_v53, %v777_v54 }
 0xf50   :  { %781 = vrot.lane.b32.xlu1 %v779_v55, %s2661_s3 }
 0xfc2   :  { %v782_v56 = vpop.permute.xlu1 %781 }
 0xfc3   :  { %v784_v57 = vadd.f32 %v782_v56, %v774_v10 }
 0xfc5   :  { %2500 = vtanh.f32 %v784_v57 }
 0xfcf   :  { %v2501_v58 = vpop.eup %2500 }
 0xfd0   :  { %787 = vrot.lane.b32.xlu0 %v2501_v58, %s2660_s15 }
0x1042   :  { %v788_v59 = vpop.permute.xlu0 %787 }
0x1043   :  { %v790_v60 = vmul.f32 %v2499_v53, %v788_v59  ;;  %v2017_v53 = vld [vmem:[%s3002_s6] ss:$0 sm:$0xff] }
0x1045   :  { %792 = vrot.lane.b32.xlu1 %v790_v60, %s2661_s3 }
0x10b7   :  { %v793_v61 = vpop.permute.xlu1 %792 }
0x10b8   :  { %795 = vst.msk [vmem:[#allocation3 + $0xa] sm:$0x3] %vm279_vm3, %v793_v61  ;;  %2211 = vmatmul.mubr.msk.f32.vlgmr.msra.gmra.mrb[6].mxu1 %vm176_vm4, %v793_v61 }
0x10b9   :  { %2232 = vmatprep.mubr.msk.f32.mxu1 %vm176_vm4, %v1011_v62  ;;  %2385 = vmatpush3.bf16.msra.mxu1 %v2382_v38 }
0x10ba   :  { %2387 = vmatprep.subr.bf16.mxu1 %v2386_v41 }
0x10bd   :  { %2389 = vmatpush3.bf16.msra.mxu1 %v2386_v41 }
0x10be   :  { %2396 = vmatprep.subr.bf16.mxu1 %v2657_v0 }
0x118b   :  { %v865_v2 = vpop.f32.mrb[6].mxu1 }
0x118c   :  { %v869_v3 = vadd.f32 %v865_v2, %v796_v63  ;;  %v2212_v4 = vpop.f32.mrb[7].mxu1 }
0x118e   :  { %2502 = vtanh.f32 %v869_v3  ;;  %v2014_v6 = vmul.f32 -1.442695, %v869_v3 }
0x1190   :  { %2504 = vpow2.f32 %v2014_v6 }
0x1198   :  { %v2503_v5 = vpop.eup %2502 }
0x1199   :  { %879 = vrot.lane.b32.xlu0 %v2503_v5, %s2660_s15 }
0x119a   :  { %v2505_v7 = vpop.eup %2504 }
0x119b   :  { %v873_v9 = vadd.f32 1.0, %v2505_v7 }
0x119d   :  { %2506 = vrcp.f32 %v873_v9 }
0x11a7   :  { %v2507_v11 = vpop.eup %2506 }
0x11a8   :  { %v877_v14 = vmul.f32 %v2507_v11, %v784_v57 }
0x120b   :  { %v880_v12 = vpop.permute.xlu0 %879 }
0x120c   :  { %v882_v13 = vmul.f32 %v2507_v11, %v880_v12 }
0x120e   :  { %884 = vrot.lane.b32.xlu1 %v882_v13, %s2661_s3 }
0x1280   :  { %v885_v15 = vpop.permute.xlu1 %884 }
0x1281   :  { %v887_v16 = vadd.f32 %v885_v15, %v877_v14 }
0x1283   :  { %2508 = vtanh.f32 %v887_v16 }
0x128d   :  { %v2509_v17 = vpop.eup %2508 }
0x128e   :  { %890 = vrot.lane.b32.xlu0 %v2509_v17, %s2660_s15 }
0x1300   :  { %v891_v18 = vpop.permute.xlu0 %890 }
0x1301   :  { %v893_v19 = vmul.f32 %v2507_v11, %v891_v18 }
0x1303   :  { %895 = vrot.lane.b32.xlu1 %v893_v19, %s2661_s3 }
0x1375   :  { %v896_v20 = vpop.permute.xlu1 %895 }
0x1376   :  { %898 = vst.msk [vmem:[#allocation3 + $0xc] sm:$0x3] %vm279_vm3, %v896_v20  ;;  %2222 = vmatmul.mubr.msk.f32.vlgmr.msra.gmra.mrb[8].mxu0 %vm176_vm4, %v896_v20 }
0x1377   :  { %2243 = vmatprep.mubr.msk.f32.mxu0 %vm2658_vm0, %v2659_v1  ;;  %2392 = vmatpush3.bf16.msra.mxu0 %v2891_v45 }
0x1378   :  { %2393 = vmatprep.subr.bf16.mxu0 %v2657_v0 }
0x137b   :  { %2395 = vmatpush3.bf16.msra.mxu0 %v2894_v49 }
0x137c   :  { %2402 = vmatprep.subr.bf16.mxu0 %v2657_v0 }
0x137e   :  { %2244 = vmatmul.mubr.f32.vlgmr.msra.gmra.mrb[10].mxu0 %v2659_v1 }
0x137f   :  { %2404 = vmatpush3.bf16.msra.mxu0 %v2891_v45  ;;  %2265 = vmatprep.mubr.msk.f32.mxu0 %vm2658_vm0, %v2659_v1 }
0x1380   :  { %2405 = vmatprep.subr.bf16.mxu0 %v2657_v0 }
0x1383   :  { %2407 = vmatpush3.bf16.msra.mxu0 %v2894_v49 }
0x1384   :  { %2414 = vmatprep.subr.bf16.mxu0 %v2657_v0 }
0x1449   :  { %v968_v22 = vpop.f32.mrb[8].mxu0 }
0x144a   :  { %v972_v23 = vadd.f32 %v968_v22, %v899_v21  ;;  %v2223_v24 = vpop.f32.mrb[9].mxu0 }
0x144c   :  { %2510 = vtanh.f32 %v972_v23  ;;  %v2016_v26 = vmul.f32 -1.442695, %v972_v23 }
0x144e   :  { %2512 = vpow2.f32 %v2016_v26 }
0x1451   :  { %v1169_v8 = vpop.f32.mrb[10].mxu0 }
0x1452   :  { %v2245_v52 = vpop.f32.mrb[11].mxu0 }
0x1456   :  { %v2511_v25 = vpop.eup %2510 }
0x1457   :  { %982 = vrot.lane.b32.xlu0 %v2511_v25, %s2660_s15 }
0x1458   :  { %v2513_v27 = vpop.eup %2512 }
0x1459   :  { %v976_v28 = vadd.f32 1.0, %v2513_v27 }
0x145b   :  { %2514 = vrcp.f32 %v976_v28 }
0x1465   :  { %v2515_v29 = vpop.eup %2514 }
0x1466   :  { %v980_v32 = vmul.f32 %v2515_v29, %v887_v16 }
0x14c9   :  { %v983_v30 = vpop.permute.xlu0 %982 }
0x14ca   :  { %v985_v31 = vmul.f32 %v2515_v29, %v983_v30 }
0x14cc   :  { %987 = vrot.lane.b32.xlu1 %v985_v31, %s2661_s3 }
0x153e   :  { %v988_v33 = vpop.permute.xlu1 %987 }
0x153f   :  { %v990_v34 = vadd.f32 %v988_v33, %v980_v32 }
0x1541   :  { %2516 = vtanh.f32 %v990_v34 }
0x154b   :  { %v2517_v35 = vpop.eup %2516 }
0x154c   :  { %993 = vrot.lane.b32.xlu0 %v2517_v35, %s2660_s15 }
0x15be   :  { %v994_v47 = vpop.permute.xlu0 %993 }
0x15bf   :  { %v996_v48 = vmul.f32 %v2515_v29, %v994_v47 }
0x15c1   :  { %998 = vrot.lane.b32.xlu1 %v996_v48, %s2661_s3 }
0x1633   :  { %v999_v50 = vpop.permute.xlu1 %998 }
0x1634   :  { %1001 = vst.msk [vmem:[#allocation3 + $0xe] sm:$0x3] %vm279_vm3, %v999_v50 }
0x163b   :  { %v1012_v51 = vld [vmem:[#allocation3 + $0x8] sm:$0xff] }
0x163c   :  { %2233 = vmatmul.mubr.msk.f32.vlgmr.msra.gmra.mrb[8].mxu1 %vm176_vm4, %v1012_v51 }
0x163d   :  { %2398 = vmatpush3.bf16.msra.mxu1 %v2891_v45  ;;  %2254 = vmatprep.mubr.msk.f32.mxu1 %vm2658_vm0, %v2659_v1 }
0x163e   :  { %2399 = vmatprep.subr.bf16.mxu1 %v2657_v0 }
0x1641   :  { %2401 = vmatpush3.bf16.msra.mxu1 %v2894_v49 }
0x1642   :  { %2408 = vmatprep.subr.bf16.mxu1 %v2657_v0 }
0x170f   :  { %v2234_v54 = vpop.f32.mrb[8].mxu1 }
0x1710   :  { %v1097_v55 = vadd.f32 %v2234_v54, %v2017_v53  ;;  %v1091_v10 = vpop.f32.mrb[9].mxu1 }
0x1711   :  { %v1092_v56 = vadd.f32 %v2017_v53, %v1091_v10 }
0x1712   :  { %1101 = vst [vmem:[#allocation2 + $0x8] sm:$0xff] %v1097_v55 }
0x1713   :  { %1100 = vst [vmem:[#allocation2] sm:$0xff] %v1092_v56 }
0x171a   :  { %v1102_v57 = vld [vmem:[#allocation2] sm:$0x3]  ;;  %v1198_v13 = vld [vmem:[#allocation2 + $0x2] sm:$0x3]  ;;  %v1299_v31 = vld [vmem:[#allocation2 + $0x4] sm:$0x3] }
0x171b   :  { %v1173_v58 = vadd.f32 %v1169_v8, %v1102_v57  ;;  %v1400_v51 = vld [vmem:[#allocation2 + $0x6] sm:$0x3] }
0x171d   :  { %2518 = vtanh.f32 %v1173_v58  ;;  %v2020_v60 = vmul.f32 -1.442695, %v1173_v58 }
0x171f   :  { %2520 = vpow2.f32 %v2020_v60 }
0x1727   :  { %v2519_v59 = vpop.eup %2518 }
0x1728   :  { %1183 = vrot.lane.b32.xlu0 %v2519_v59, %s2660_s15 }
0x1729   :  { %v2521_v61 = vpop.eup %2520 }
0x172a   :  { %v1177_v62 = vadd.f32 1.0, %v2521_v61 }
0x172c   :  { %2522 = vrcp.f32 %v1177_v62 }
0x1736   :  { %v2523_v63 = vpop.eup %2522 }
0x1737   :  { %v1181_v4 = vmul.f32 0.0, %v2523_v63 }
0x179a   :  { %v1184_v2 = vpop.permute.xlu0 %1183 }
0x179b   :  { %v1186_v3 = vmul.f32 %v2523_v63, %v1184_v2 }
0x179d   :  { %1188 = vrot.lane.b32.xlu1 %v1186_v3, %s2661_s3 }
0x180f   :  { %v1189_v5 = vpop.permute.xlu1 %1188 }
0x1810   :  { %v1191_v6 = vadd.f32 %v1189_v5, %v1181_v4  ;;  %v1501_v5 = vld [vmem:[#allocation2 + $0x8] sm:$0x3] }
0x1812   :  { %2524 = vtanh.f32 %v1191_v6 }
0x181c   :  { %v2525_v7 = vpop.eup %2524 }
0x181d   :  { %1194 = vrot.lane.b32.xlu0 %v2525_v7, %s2660_s15 }
0x188f   :  { %v1195_v9 = vpop.permute.xlu0 %1194 }
0x1890   :  { %v1197_v11 = vmul.f32 %v2523_v63, %v1195_v9 }
0x1892   :  { %1200 = vrot.lane.b32.xlu1 %v1197_v11, %s2661_s3 }
0x1904   :  { %v1201_v12 = vpop.permute.xlu1 %1200 }
0x1905   :  { %2255 = vmatmul.mubr.msk.f32.vlgmr.msra.gmra.mrb[10].mxu1 %vm176_vm4, %v1201_v12 }
0x1906   :  { %2410 = vmatpush3.bf16.msra.mxu1 %v2891_v45  ;;  %2276 = vmatprep.mubr.msk.f32.mxu1 %vm2658_vm0, %v2659_v1 }
0x1907   :  { %2411 = vmatprep.subr.bf16.mxu1 %v2657_v0 }
0x190a   :  { %2413 = vmatpush3.bf16.msra.mxu1 %v2894_v49 }
0x190b   :  { %2420 = vmatprep.subr.bf16.mxu1 %v2657_v0 }
0x19d8   :  { %v1270_v14 = vpop.f32.mrb[10].mxu1 }
0x19d9   :  { %v1274_v15 = vadd.f32 %v1270_v14, %v1198_v13  ;;  %v2256_v16 = vpop.f32.mrb[11].mxu1 }
0x19db   :  { %2526 = vtanh.f32 %v1274_v15  ;;  %v2022_v18 = vmul.f32 -1.442695, %v1274_v15 }
0x19dd   :  { %2528 = vpow2.f32 %v2022_v18 }
0x19e5   :  { %v2527_v17 = vpop.eup %2526 }
0x19e6   :  { %1284 = vrot.lane.b32.xlu0 %v2527_v17, %s2660_s15 }
0x19e7   :  { %v2529_v19 = vpop.eup %2528 }
0x19e8   :  { %v1278_v20 = vadd.f32 1.0, %v2529_v19 }
0x19ea   :  { %2530 = vrcp.f32 %v1278_v20 }
0x19f4   :  { %v2531_v21 = vpop.eup %2530 }
0x19f5   :  { %v1282_v24 = vmul.f32 %v2531_v21, %v1191_v6 }
0x1a58   :  { %v1285_v22 = vpop.permute.xlu0 %1284 }
0x1a59   :  { %v1287_v23 = vmul.f32 %v2531_v21, %v1285_v22 }
0x1a5b   :  { %1289 = vrot.lane.b32.xlu1 %v1287_v23, %s2661_s3 }
0x1acd   :  { %v1290_v25 = vpop.permute.xlu1 %1289 }
0x1ace   :  { %v1292_v26 = vadd.f32 %v1290_v25, %v1282_v24  ;;  %v1602_v25 = vld [vmem:[#allocation2 + $0xa] sm:$0x3] }
0x1ad0   :  { %2532 = vtanh.f32 %v1292_v26 }
0x1ada   :  { %v2533_v27 = vpop.eup %2532 }
0x1adb   :  { %1295 = vrot.lane.b32.xlu0 %v2533_v27, %s2660_s15 }
0x1b4d   :  { %v1296_v28 = vpop.permute.xlu0 %1295 }
0x1b4e   :  { %v1298_v29 = vmul.f32 %v2531_v21, %v1296_v28 }
0x1b50   :  { %1301 = vrot.lane.b32.xlu1 %v1298_v29, %s2661_s3 }
0x1bc2   :  { %v1302_v30 = vpop.permute.xlu1 %1301 }
0x1bc3   :  { %2266 = vmatmul.mubr.msk.f32.vlgmr.msra.gmra.mrb[12].mxu0 %vm176_vm4, %v1302_v30 }
0x1bc4   :  { %2416 = vmatpush3.bf16.msra.mxu0 %v2891_v45  ;;  %2287 = vmatprep.mubr.msk.f32.mxu0 %vm2658_vm0, %v2659_v1 }
0x1bc5   :  { %2417 = vmatprep.subr.bf16.mxu0 %v2657_v0 }
0x1bc8   :  { %2419 = vmatpush3.bf16.msra.mxu0 %v2894_v49 }
0x1bc9   :  { %2426 = vmatprep.subr.bf16.mxu0 %v2657_v0 }
0x1c96   :  { %v1371_v32 = vpop.f32.mrb[12].mxu0 }
0x1c97   :  { %v1375_v33 = vadd.f32 %v1371_v32, %v1299_v31  ;;  %v2267_v34 = vpop.f32.mrb[13].mxu0 }
0x1c99   :  { %2534 = vtanh.f32 %v1375_v33  ;;  %v2024_v36 = vmul.f32 -1.442695, %v1375_v33 }
0x1c9b   :  { %2536 = vpow2.f32 %v2024_v36 }
0x1ca3   :  { %v2535_v35 = vpop.eup %2534 }
0x1ca4   :  { %1385 = vrot.lane.b32.xlu0 %v2535_v35, %s2660_s15 }
0x1ca5   :  { %v2537_v37 = vpop.eup %2536 }
0x1ca6   :  { %v1379_v38 = vadd.f32 1.0, %v2537_v37 }
0x1ca8   :  { %2538 = vrcp.f32 %v1379_v38 }
0x1cb2   :  { %v2539_v39 = vpop.eup %2538 }
0x1cb3   :  { %v1383_v42 = vmul.f32 %v2539_v39, %v1292_v26 }
0x1d16   :  { %v1386_v40 = vpop.permute.xlu0 %1385 }
0x1d17   :  { %v1388_v41 = vmul.f32 %v2539_v39, %v1386_v40 }
0x1d19   :  { %1390 = vrot.lane.b32.xlu1 %v1388_v41, %s2661_s3  ;;  %v1703_v41 = vld [vmem:[#allocation2 + $0xc] sm:$0x3] }
0x1d8b   :  { %v1391_v43 = vpop.permute.xlu1 %1390 }
0x1d8c   :  { %v1393_v44 = vadd.f32 %v1391_v43, %v1383_v42 }
0x1d8e   :  { %2540 = vtanh.f32 %v1393_v44 }
0x1d98   :  { %v2541_v46 = vpop.eup %2540 }
0x1d99   :  { %1396 = vrot.lane.b32.xlu0 %v2541_v46, %s2660_s15 }
0x1e0b   :  { %v1397_v47 = vpop.permute.xlu0 %1396 }
0x1e0c   :  { %v1399_v48 = vmul.f32 %v2539_v39, %v1397_v47 }
0x1e0e   :  { %1402 = vrot.lane.b32.xlu1 %v1399_v48, %s2661_s3 }
0x1e80   :  { %v1403_v50 = vpop.permute.xlu1 %1402 }
0x1e81   :  { %2277 = vmatmul.mubr.msk.f32.vlgmr.msra.gmra.mrb[12].mxu1 %vm176_vm4, %v1403_v50 }
0x1e82   :  { %2422 = vmatpush3.bf16.msra.mxu1 %v2891_v45  ;;  %2298 = vmatprep.mubr.msk.f32.mxu1 %vm2658_vm0, %v2659_v1 }
0x1e83   :  { %2423 = vmatprep.subr.bf16.mxu1 %v2657_v0 }
0x1e86   :  { %2425 = vmatpush3.bf16.msra.mxu1 %v2894_v49 }
0x1e87   :  { %2432 = vmatprep.subr.bf16.mxu1 %v2657_v0 }
0x1f54   :  { %v1472_v8 = vpop.f32.mrb[12].mxu1 }
0x1f55   :  { %v1476_v52 = vadd.f32 %v1472_v8, %v1400_v51  ;;  %v2278_v53 = vpop.f32.mrb[13].mxu1 }
0x1f57   :  { %2542 = vtanh.f32 %v1476_v52  ;;  %v2026_v55 = vmul.f32 -1.442695, %v1476_v52 }
0x1f59   :  { %2544 = vpow2.f32 %v2026_v55 }
0x1f61   :  { %v2543_v54 = vpop.eup %2542 }
0x1f62   :  { %1486 = vrot.lane.b32.xlu0 %v2543_v54, %s2660_s15 }
0x1f63   :  { %v2545_v10 = vpop.eup %2544 }
0x1f64   :  { %v1480_v56 = vadd.f32 1.0, %v2545_v10 }
0x1f66   :  { %2546 = vrcp.f32 %v1480_v56 }
0x1f70   :  { %v2547_v57 = vpop.eup %2546 }
0x1f71   :  { %v1484_v60 = vmul.f32 %v2547_v57, %v1393_v44 }
0x1fd4   :  { %v1487_v58 = vpop.permute.xlu0 %1486 }
0x1fd5   :  { %v1489_v59 = vmul.f32 %v2547_v57, %v1487_v58  ;;  %v1804_v58 = vld [vmem:[#allocation2 + $0xe] sm:$0x3] }
0x1fd7   :  { %1491 = vrot.lane.b32.xlu1 %v1489_v59, %s2661_s3 }
0x2049   :  { %v1492_v61 = vpop.permute.xlu1 %1491 }
0x204a   :  { %v1494_v62 = vadd.f32 %v1492_v61, %v1484_v60 }
0x204c   :  { %2548 = vtanh.f32 %v1494_v62 }
0x2056   :  { %v2549_v63 = vpop.eup %2548 }
0x2057   :  { %1497 = vrot.lane.b32.xlu0 %v2549_v63, %s2660_s15 }
0x20c9   :  { %v1498_v2 = vpop.permute.xlu0 %1497 }
0x20ca   :  { %v1500_v3 = vmul.f32 %v2547_v57, %v1498_v2 }
0x20cc   :  { %1503 = vrot.lane.b32.xlu1 %v1500_v3, %s2661_s3 }
0x213e   :  { %v1504_v4 = vpop.permute.xlu1 %1503 }
0x213f   :  { %2288 = vmatmul.mubr.msk.f32.vlgmr.msra.gmra.mrb[14].mxu0 %vm176_vm4, %v1504_v4 }
0x2140   :  { %2428 = vmatpush3.bf16.msra.mxu0 %v2891_v45  ;;  %2309 = vmatprep.mubr.msk.f32.mxu0 %vm2658_vm0, %v2659_v1 }
0x2141   :  { %2429 = vmatprep.subr.bf16.mxu0 %v2657_v0 }
0x2144   :  { %2431 = vmatpush3.bf16.msra.mxu0 %v2894_v49 }
0x2145   :  { %2438 = vmatprep.subr.bf16.mxu0 %v2657_v0 }
0x2212   :  { %v1573_v6 = vpop.f32.mrb[14].mxu0 }
0x2213   :  { %v1577_v7 = vadd.f32 %v1573_v6, %v1501_v5  ;;  %v2289_v9 = vpop.f32.mrb[15].mxu0 }
0x2215   :  { %2550 = vtanh.f32 %v1577_v7  ;;  %v2028_v12 = vmul.f32 -1.442695, %v1577_v7 }
0x2217   :  { %2552 = vpow2.f32 %v2028_v12  ;;  %v1905_v12 = vld [vmem:[#allocation8] sm:$0xff] }
0x221f   :  { %v2551_v11 = vpop.eup %2550 }
0x2220   :  { %1587 = vrot.lane.b32.xlu0 %v2551_v11, %s2660_s15 }
0x2221   :  { %v2553_v13 = vpop.eup %2552 }
0x2222   :  { %v1581_v14 = vadd.f32 1.0, %v2553_v13  ;;  %v1906_v13 = vld [vmem:[#allocation8 + $0x8] sm:$0xff] }
0x2224   :  { %2554 = vrcp.f32 %v1581_v14  ;;  %v1907_v14 = vld [vmem:[#allocation8 + $0x10] sm:$0xff] }
0x222e   :  { %v2555_v15 = vpop.eup %2554 }
0x222f   :  { %v1585_v18 = vmul.f32 %v2555_v15, %v1494_v62 }
0x2292   :  { %v1588_v16 = vpop.permute.xlu0 %1587 }
0x2293   :  { %v1590_v17 = vmul.f32 %v2555_v15, %v1588_v16  ;;  %v1908_v16 = vld [vmem:[#allocation8 + $0x18] sm:$0xff] }
0x2295   :  { %1592 = vrot.lane.b32.xlu1 %v1590_v17, %s2661_s3  ;;  %v2442_v17 = vpack.c.bf16 %v1908_v16, %v1907_v14 }
0x2307   :  { %v1593_v19 = vpop.permute.xlu1 %1592 }
0x2308   :  { %v1595_v20 = vadd.f32 %v1593_v19, %v1585_v18 }
0x230a   :  { %2556 = vtanh.f32 %v1595_v20 }
0x2314   :  { %v2557_v21 = vpop.eup %2556 }
0x2315   :  { %1598 = vrot.lane.b32.xlu0 %v2557_v21, %s2660_s15 }
0x2387   :  { %v1599_v22 = vpop.permute.xlu0 %1598 }
0x2388   :  { %v1601_v23 = vmul.f32 %v2555_v15, %v1599_v22  ;;  %v2439_v15 = vpack.c.bf16 %v1906_v13, %v1905_v12  ;;  %v2035_v22 = vld [vmem:[%s3004_s8] ss:$0 sm:$0xff] }
0x238a   :  { %1604 = vrot.lane.b32.xlu1 %v1601_v23, %s2661_s3 }
0x23fc   :  { %v1605_v24 = vpop.permute.xlu1 %1604 }
0x23fd   :  { %2299 = vmatmul.mubr.msk.f32.vlgmr.msra.gmra.mrb[14].mxu1 %vm176_vm4, %v1605_v24 }
0x23fe   :  { %2434 = vmatpush3.bf16.msra.mxu1 %v2891_v45  ;;  %2320 = vmatprep.mubr.msk.f32.mxu1 %vm2658_vm0, %v2659_v1 }
0x23ff   :  { %2435 = vmatprep.subr.bf16.mxu1 %v2657_v0 }
0x2402   :  { %2437 = vmatpush3.bf16.msra.mxu1 %v2894_v49 }
0x24d0   :  { %v1674_v26 = vpop.f32.mrb[14].mxu1 }
0x24d1   :  { %v1678_v27 = vadd.f32 %v1674_v26, %v1602_v25  ;;  %v2300_v28 = vpop.f32.mrb[15].mxu1 }
0x24d3   :  { %2558 = vtanh.f32 %v1678_v27  ;;  %v2030_v30 = vmul.f32 -1.442695, %v1678_v27 }
0x24d5   :  { %2560 = vpow2.f32 %v2030_v30 }
0x24dd   :  { %v2559_v29 = vpop.eup %2558 }
0x24de   :  { %1688 = vrot.lane.b32.xlu0 %v2559_v29, %s2660_s15 }
0x24df   :  { %v2561_v31 = vpop.eup %2560 }
0x24e0   :  { %v1682_v32 = vadd.f32 1.0, %v2561_v31 }
0x24e2   :  { %2562 = vrcp.f32 %v1682_v32 }
0x24ec   :  { %v2563_v45 = vpop.eup %2562 }
0x24ed   :  { %v1686_v35 = vmul.f32 %v2563_v45, %v1595_v20 }
0x2550   :  { %v1689_v33 = vpop.permute.xlu0 %1688 }
0x2551   :  { %v1691_v34 = vmul.f32 %v2563_v45, %v1689_v33 }
0x2553   :  { %1693 = vrot.lane.b32.xlu1 %v1691_v34, %s2661_s3 }
0x25c5   :  { %v1694_v49 = vpop.permute.xlu1 %1693 }
0x25c6   :  { %v1696_v36 = vadd.f32 %v1694_v49, %v1686_v35 }
0x25c8   :  { %2564 = vtanh.f32 %v1696_v36 }
0x25d2   :  { %v2565_v37 = vpop.eup %2564 }
0x25d3   :  { %1699 = vrot.lane.b32.xlu0 %v2565_v37, %s2660_s15 }
0x2645   :  { %v1700_v38 = vpop.permute.xlu0 %1699 }
0x2646   :  { %v1702_v39 = vmul.f32 %v2563_v45, %v1700_v38 }
0x2648   :  { %1705 = vrot.lane.b32.xlu1 %v1702_v39, %s2661_s3 }
0x26ba   :  { %v1706_v40 = vpop.permute.xlu1 %1705 }
0x26bb   :  { %2310 = vmatmul.mubr.msk.f32.vlgmr.msra.gmra.mrb[16].mxu0 %vm176_vm4, %v1706_v40 }
0x26bc   :  { %2331 = vmatprep.mubr.msk.f32.mxu0 %vm2658_vm0, %v2659_v1  ;;  %2440 = vmatpush3.bf16.msra.mxu0 %v2439_v15 }
0x26bd   :  { %2441 = vmatprep.subr.bf16.mxu0 %v2657_v0 }
0x26c0   :  { %2443 = vmatpush3.bf16.msra.mxu0 %v2442_v17 }
0x278e   :  { %v1775_v42 = vpop.f32.mrb[16].mxu0 }
0x278f   :  { %v1779_v43 = vadd.f32 %v1775_v42, %v1703_v41  ;;  %v2311_v44 = vpop.f32.mrb[17].mxu0 }
0x2791   :  { %2566 = vtanh.f32 %v1779_v43  ;;  %v2032_v47 = vmul.f32 -1.442695, %v1779_v43 }
0x2793   :  { %2568 = vpow2.f32 %v2032_v47 }
0x279b   :  { %v2567_v46 = vpop.eup %2566 }
0x279c   :  { %1789 = vrot.lane.b32.xlu0 %v2567_v46, %s2660_s15 }
0x279d   :  { %v2569_v48 = vpop.eup %2568 }
0x279e   :  { %v1783_v50 = vadd.f32 1.0, %v2569_v48 }
0x27a0   :  { %2570 = vrcp.f32 %v1783_v50 }
0x27aa   :  { %v2571_v51 = vpop.eup %2570 }
0x27ab   :  { %v1787_v53 = vmul.f32 %v2571_v51, %v1696_v36 }
0x280e   :  { %v1790_v8 = vpop.permute.xlu0 %1789 }
0x280f   :  { %v1792_v52 = vmul.f32 %v2571_v51, %v1790_v8 }
0x2811   :  { %1794 = vrot.lane.b32.xlu1 %v1792_v52, %s2661_s3 }
0x2883   :  { %v1795_v1 = vpop.permute.xlu1 %1794 }
0x2884   :  { %v1797_v54 = vadd.f32 %v1795_v1, %v1787_v53 }
0x2886   :  { %2572 = vtanh.f32 %v1797_v54 }
0x2890   :  { %v2573_v55 = vpop.eup %2572 }
0x2891   :  { %1800 = vrot.lane.b32.xlu0 %v2573_v55, %s2660_s15 }
0x2903   :  { %v1801_v10 = vpop.permute.xlu0 %1800 }
0x2904   :  { %v1803_v56 = vmul.f32 %v2571_v51, %v1801_v10 }
0x2906   :  { %1806 = vrot.lane.b32.xlu1 %v1803_v56, %s2661_s3 }
0x2978   :  { %v1807_v57 = vpop.permute.xlu1 %1806 }
0x2979   :  { %2321 = vmatmul.mubr.msk.f32.vlgmr.msra.gmra.mrb[16].mxu1 %vm176_vm4, %v1807_v57 }
0x2a4c   :  { %v1876_v59 = vpop.f32.mrb[16].mxu1 }
0x2a4d   :  { %v1880_v60 = vadd.f32 %v1876_v59, %v1804_v58  ;;  %v2322_v61 = vpop.f32.mrb[17].mxu1 }
0x2a4f   :  { %2574 = vtanh.f32 %v1880_v60  ;;  %v2034_v63 = vmul.f32 -1.442695, %v1880_v60 }
0x2a51   :  { %2576 = vpow2.f32 %v2034_v63 }
0x2a59   :  { %v2575_v62 = vpop.eup %2574 }
0x2a5a   :  { %1890 = vrot.lane.b32.xlu0 %v2575_v62, %s2660_s15 }
0x2a5b   :  { %v2577_v2 = vpop.eup %2576 }
0x2a5c   :  { %v1884_v3 = vadd.f32 1.0, %v2577_v2 }
0x2a5e   :  { %2578 = vrcp.f32 %v1884_v3 }
0x2a68   :  { %v2579_v4 = vpop.eup %2578 }
0x2a69   :  { %v1888_v7 = vmul.f32 %v2579_v4, %v1797_v54 }
0x2acc   :  { %v1891_v5 = vpop.permute.xlu0 %1890 }
0x2acd   :  { %v1893_v6 = vmul.f32 %v2579_v4, %v1891_v5 }
0x2acf   :  { %1895 = vrot.lane.b32.xlu1 %v1893_v6, %s2661_s3 }
0x2b41   :  { %v1896_v9 = vpop.permute.xlu1 %1895 }
0x2b42   :  { %v1898_v11 = vadd.f32 %v1896_v9, %v1888_v7 }
0x2b44   :  { %2580 = vtanh.f32 %v1898_v11 }
0x2b4e   :  { %v2581_v18 = vpop.eup %2580 }
0x2b4f   :  { %1901 = vrot.lane.b32.xlu0 %v2581_v18, %s2660_s15 }
0x2bc1   :  { %v1902_v19 = vpop.permute.xlu0 %1901 }
0x2bc2   :  { %v1904_v20 = vmul.f32 %v2579_v4, %v1902_v19 }
0x2bc4   :  { %1917 = vrot.lane.b32.xlu1 %v1904_v20, %s2661_s3 }
0x2c36   :  { %v1918_v21 = vpop.permute.xlu1 %1917 }
0x2c37   :  { %2332 = vmatmul.mubr.msk.f32.vlgmr.msra.gmra.mrb[18].mxu0 %vm176_vm4, %v1918_v21 }
0x2d0a   :  { %v1987_v23 = vpop.f32.mrb[18].mxu0 }
0x2d0b   :  { %v1988_v24 = vadd.f32 %v2035_v22, %v1987_v23  ;;  %v2333_v25 = vpop.f32.mrb[19].mxu0 }
0x2d0d   :  { %1991 = vst [vmem:[%s3005_s9] sm:$0x3] %v1988_v24 }
0x2d0e   :  { %1996 = vsyncpa [#allocation5], 1 }
0x2d0f   :  { %1997 = vsyncpa [#allocation7], 1 }

</bundles_post_ra>
